<compile_context>
chip_gen: v6e
topology: v6e:2x2x1
jax: 0.10.0
libtpu: 0.0.40
codegen_flags: <defaults>
</compile_context>

<pallas_src>
import functools

import jax
import jax.numpy as jnp
from jax import lax
from jax.experimental import pallas as pl
from jax.experimental.pallas import tpu as pltpu

_EPS = 1e-5
_LANE = 128


def _full_spec(shape):
    """BlockSpec that always maps to block (0, 0, ...) — whole (small) array."""
    n = len(shape)
    return pl.BlockSpec(shape, lambda b: (0,) * n)


def _basic_block_kernel(stride, Ho, Wo, has_projection,
                        xpd_ref, w1_ref, s1_ref, b1_ref,
                        w2_ref, s2_ref, b2_ref, *rest):
    """Fused BasicBlock for ONE image (grid runs over batch).

    xpd_ref : (1, s*s, Hs, Ws, Cp)  phase-decomposed padded input tile
    w1_ref  : (9*Cp, Kp)            conv1 weights, K = (kh*3+kw)*Cp + cin
    w2_ref  : (9*Kp, Kp)            conv2 weights
    s*/b*   : (1, Kp)               folded BN scale / bias (f32)
    wsc_ref : (Cp, Kp)              1x1 projection weights (if present)
    out_ref : (1, Ho*Wo, Kp)
    pad_ref : (Ho+2, Wo+2, Kp)      VMEM scratch for the conv2 halo
    """
    if has_projection:
        wsc_ref, ssc_ref, bsc_ref, out_ref, pad_ref = rest
    else:
        out_ref, pad_ref = rest

    Cp = xpd_ref.shape[-1]
    Kp = w1_ref.shape[-1]
    M = Ho * Wo

    # ---- conv1 (3x3, stride s): one (M, 9*Cp) x (9*Cp, Kp) MXU contraction ----
    taps = []
    for kh in range(3):
        for kw in range(3):
            ph, oh = kh % stride, kh // stride
            pw, ow = kw % stride, kw // stride
            t = xpd_ref[0, ph * stride + pw, oh:oh + Ho, ow:ow + Wo, :]
            taps.append(t.reshape(M, Cp))
    col1 = jnp.concatenate(taps, axis=-1)                          # (M, 9*Cp)
    h = jnp.dot(col1, w1_ref[...], preferred_element_type=jnp.float32)
    h = jnp.maximum(h * s1_ref[...] + b1_ref[...], 0.0)            # bn1 + relu

    # ---- conv2 (3x3, stride 1): stage h into padded scratch, zero only the
    # 1-px halo (interior is fully overwritten), then one fused contraction ----
    zrow = jnp.zeros((1, Wo + 2, Kp), pad_ref.dtype)
    zcol = jnp.zeros((Ho + 2, 1, Kp), pad_ref.dtype)
    pad_ref[0:1, :, :] = zrow
    pad_ref[Ho + 1:Ho + 2, :, :] = zrow
    pad_ref[:, 0:1, :] = zcol
    pad_ref[:, Wo + 1:Wo + 2, :] = zcol
    pad_ref[1:Ho + 1, 1:Wo + 1, :] = h.reshape(Ho, Wo, Kp).astype(pad_ref.dtype)

    taps2 = [pad_ref[kh:kh + Ho, kw:kw + Wo, :].reshape(M, Kp)
             for kh in range(3) for kw in range(3)]
    col2 = jnp.concatenate(taps2, axis=-1)                         # (M, 9*Kp)
    o = jnp.dot(col2, w2_ref[...], preferred_element_type=jnp.float32)
    o = o * s2_ref[...] + b2_ref[...]                              # bn2

    # ---- shortcut: center tap of the already-resident tile == x[:, ::s, ::s] ----
    phc, ohc = 1 % stride, 1 // stride
    xc = xpd_ref[0, phc * stride + phc, ohc:ohc + Ho, ohc:ohc + Wo, :]
    xc = xc.reshape(M, Cp)
    if has_projection:
        sc = jnp.dot(xc, wsc_ref[...], preferred_element_type=jnp.float32)
        sc = sc * ssc_ref[...] + bsc_ref[...]                      # bn on projection
    else:
        sc = xc.astype(jnp.float32)                                # identity path

    out_ref[...] = jnp.maximum(o + sc, 0.0).reshape(1, M, Kp).astype(out_ref.dtype)


def basic_block_pallas(x_nchw, p, stride, compute_dtype=jnp.float32):
    """BasicBlock forward.  compute_dtype=jnp.bfloat16 is recommended on v6e/v7x
    (matmuls keep f32 accumulation); f32 is used here for exact ref checking."""
    has_projection = 'conv_sc_w' in p
    B, Cin, H, W = x_nchw.shape
    Cout = p['conv1_w'].shape[0]
    if not has_projection:
        assert stride == 1 and Cin == Cout, (
            "identity shortcut requires stride == 1 and in_planes == planes")

    s = int(stride)
    Ho = (H - 1) // s + 1
    Wo = (W - 1) // s + 1
    M = Ho * Wo

    Cp = -(-Cin // _LANE) * _LANE        # lane-dense input channels
    Kp = -(-Cout // _LANE) * _LANE       # lane-dense output channels

    # NCHW -> NHWC, pad: 1-px conv halo + channel pad + round spatial up to a
    # multiple of the stride so the phase decomposition is an exact reshape.
    Hs = 2 // s + Ho
    Ws = 2 // s + Wo
    Hp, Wp = s * Hs, s * Ws
    x = jnp.transpose(x_nchw, (0, 2, 3, 1)).astype(compute_dtype)
    xpad = jnp.pad(x, ((0, 0), (1, Hp - H - 1), (1, Wp - W - 1), (0, Cp - Cin)))
    # xpd[b, ph*s+pw, i, j, c] = xpad[b, s*i+ph, s*j+pw, c]
    xpd = (xpad.reshape(B, Hs, s, Ws, s, Cp)
               .transpose(0, 2, 4, 1, 3, 5)
               .reshape(B, s * s, Hs, Ws, Cp))

    # Weights: OIHW -> (kh, kw, cin, cout), channel-pad, flatten K = 9*C.
    w1 = jnp.transpose(p['conv1_w'], (2, 3, 1, 0))
    w1 = jnp.pad(w1, ((0, 0), (0, 0), (0, Cp - Cin), (0, Kp - Cout)))
    w1 = w1.reshape(9 * Cp, Kp).astype(compute_dtype)
    w2 = jnp.transpose(p['conv2_w'], (2, 3, 1, 0))
    w2 = jnp.pad(w2, ((0, 0), (0, 0), (0, Kp - Cout), (0, Kp - Cout)))
    w2 = w2.reshape(9 * Kp, Kp).astype(compute_dtype)

    def fold_bn(g, b, m, v):
        scale = g / jnp.sqrt(v + _EPS)
        bias = b - m * scale
        padw = (0, Kp - Cout)
        return (jnp.pad(scale, padw).reshape(1, Kp).astype(jnp.float32),
                jnp.pad(bias, padw).reshape(1, Kp).astype(jnp.float32))

    s1, b1 = fold_bn(p['bn1_g'], p['bn1_b'], p['bn1_m'], p['bn1_v'])
    s2, b2 = fold_bn(p['bn2_g'], p['bn2_b'], p['bn2_m'], p['bn2_v'])

    inputs = [xpd, w1, s1, b1, w2, s2, b2]
    in_specs = [
        pl.BlockSpec((1, s * s, Hs, Ws, Cp), lambda b: (b, 0, 0, 0, 0)),
        _full_spec((9 * Cp, Kp)),
        _full_spec((1, Kp)), _full_spec((1, Kp)),
        _full_spec((9 * Kp, Kp)),
        _full_spec((1, Kp)), _full_spec((1, Kp)),
    ]
    if has_projection:
        wsc = jnp.transpose(p['conv_sc_w'][:, :, 0, 0], (1, 0))
        wsc = jnp.pad(wsc, ((0, Cp - Cin), (0, Kp - Cout))).astype(compute_dtype)
        ssc, bsc = fold_bn(p['bn_sc_g'], p['bn_sc_b'], p['bn_sc_m'], p['bn_sc_v'])
        inputs += [wsc, ssc, bsc]
        in_specs += [_full_spec((Cp, Kp)), _full_spec((1, Kp)), _full_spec((1, Kp))]

    # VMEM budget (per grid step) + cost hint for the XLA scheduler.
    isz = jnp.dtype(compute_dtype).itemsize
    xpd_blk = s * s * Hs * Ws * Cp * isz
    w_bytes = sum(int(a.size) * a.dtype.itemsize for a in inputs[1:])
    out_blk = M * Kp * 4
    scratch_b = (Ho + 2) * (Wo + 2) * Kp * isz
    cols_b = M * 9 * (Cp + Kp) * isz
    footprint = 2 * (xpd_blk + out_blk) + w_bytes + scratch_b + cols_b
    vmem_limit = int(min(64 * 1024 * 1024, max(16 * 1024 * 1024, 2 * footprint)))

    flops = 2 * B * M * Kp * (9 * Cp + 9 * Kp + (Cp if has_projection else 0))
    bytes_accessed = int(xpd.size) * isz + w_bytes + B * M * Kp * 4
    cost = pl.CostEstimate(flops=int(flops), transcendentals=0,
                           bytes_accessed=int(bytes_accessed))

    out_flat = pl.pallas_call(
        functools.partial(_basic_block_kernel, s, Ho, Wo, has_projection),
        grid=(B,),
        out_shape=jax.ShapeDtypeStruct((B, M, Kp), jnp.float32),
        in_specs=in_specs,
        out_specs=pl.BlockSpec((1, M, Kp), lambda b: (b, 0, 0)),
        scratch_shapes=[pltpu.VMEM((Ho + 2, Wo + 2, Kp), compute_dtype)],
        compiler_params=pltpu.CompilerParams(
            dimension_semantics=("parallel",),
            vmem_limit_bytes=vmem_limit),
        cost_estimate=cost,
    )(*inputs)

    out = out_flat[:, :, :Cout].reshape(B, Ho, Wo, Cout)    # drop channel padding
    return jnp.transpose(out, (0, 3, 1, 2))                 # back to NCHW


# -------------------------- pure-JAX reference -------------------------------
def basic_block_ref(x, p, stride):
    def conv(z, w, s, pad):
        return lax.conv_general_dilated(
            z, w, (s, s), ((pad, pad), (pad, pad)),
            dimension_numbers=('NCHW', 'OIHW', 'NCHW'))

    def bn(z, g, b, m, v):
        g, b, m, v = (a.reshape(1, -1, 1, 1) for a in (g, b, m, v))
        return (z - m) / jnp.sqrt(v + _EPS) * g + b

    out = jax.nn.relu(bn(conv(x, p['conv1_w'], stride, 1),
                         p['bn1_g'], p['bn1_b'], p['bn1_m'], p['bn1_v']))
    out = bn(conv(out, p['conv2_w'], 1, 1),
             p['bn2_g'], p['bn2_b'], p['bn2_m'], p['bn2_v'])
    if 'conv_sc_w' in p:
        sc = conv(x, p['conv_sc_w'], stride, 0)
        sc = bn(sc, p['bn_sc_g'], p['bn_sc_b'], p['bn_sc_m'], p['bn_sc_v'])
    else:
        sc = x
    return jax.nn.relu(out + sc)


# -------------------- deterministic parameter construction -------------------
def make_params(key, in_planes, planes, stride):
    ks = jax.random.split(key, 16)

    def bn_params(i):
        return (1.0 + 0.1 * jax.random.normal(ks[i], (planes,), jnp.float32),   # gamma
                0.1 * jax.random.normal(ks[i + 1], (planes,), jnp.float32),     # beta
                0.05 * jax.random.normal(ks[i + 2], (planes,), jnp.float32),    # running mean
                0.5 + 0.5 * jax.nn.sigmoid(
                    jax.random.normal(ks[i + 3], (planes,), jnp.float32)))      # running var

    p = {}
    p['conv1_w'] = 0.2 * jax.random.normal(ks[0], (planes, in_planes, 3, 3), jnp.float32)
    p['conv2_w'] = 0.2 * jax.random.normal(ks[1], (planes, planes, 3, 3), jnp.float32)
    p['bn1_g'], p['bn1_b'], p['bn1_m'], p['bn1_v'] = bn_params(2)
    p['bn2_g'], p['bn2_b'], p['bn2_m'], p['bn2_v'] = bn_params(6)
    if stride != 1 or in_planes != planes:
        p['conv_sc_w'] = 0.2 * jax.random.normal(ks[10], (planes, in_planes, 1, 1), jnp.float32)
        p['bn_sc_g'], p['bn_sc_b'], p['bn_sc_m'], p['bn_sc_v'] = bn_params(11)
    return p


if __name__ == "__main__":
    key = jax.random.PRNGKey(0)
    kx1, kx2, kp1, kp2 = jax.random.split(key, 4)

    ok = True

    # Case 1: projection shortcut (in_planes=4 -> planes=8, stride=2), x: (2,4,16,16)
    x1 = jax.random.normal(kx1, (2, 4, 16, 16), jnp.float32)
    p1 = make_params(kp1, 4, 8, 2)
    y1 = jax.block_until_ready(basic_block_pallas(x1, p1, 2))
    ok &= bool(jnp.allclose(y1, basic_block_ref(x1, p1, 2), atol=1e-3, rtol=1e-3))

    # Case 2: identity shortcut (in_planes=planes=8, stride=1), x: (2,8,16,16)
    x2 = jax.random.normal(kx2, (2, 8, 16, 16), jnp.float32)
    p2 = make_params(kp2, 8, 8, 1)
    y2 = jax.block_until_ready(basic_block_pallas(x2, p2, 1))
    ok &= bool(jnp.allclose(y2, basic_block_ref(x2, p2, 1), atol=1e-3, rtol=1e-3))

    assert ok, "Pallas BasicBlock does not match JAX reference"
    print("KERNEL_OK")
</pallas_src>

<mosaic_0001>
module attributes {stable_mosaic.version = 11 : i64} {
  func.func @_basic_block_kernel(%arg0: i32, %arg1: memref<1x4x9x9x128xf32, #tpu.memory_space<vmem>>, %arg2: memref<1152x128xf32, #tpu.memory_space<vmem>>, %arg3: memref<1x128xf32, #tpu.memory_space<vmem>>, %arg4: memref<1x128xf32, #tpu.memory_space<vmem>>, %arg5: memref<1152x128xf32, #tpu.memory_space<vmem>>, %arg6: memref<1x128xf32, #tpu.memory_space<vmem>>, %arg7: memref<1x128xf32, #tpu.memory_space<vmem>>, %arg8: memref<128x128xf32, #tpu.memory_space<vmem>>, %arg9: memref<1x128xf32, #tpu.memory_space<vmem>>, %arg10: memref<1x128xf32, #tpu.memory_space<vmem>>, %arg11: memref<1x64x128xf32, #tpu.memory_space<vmem>>, %arg12: memref<10x10x128xf32, #tpu.memory_space<vmem>>) attributes {dimension_semantics = [#tpu.dimension_semantics<parallel>], iteration_bounds = array<i64: 2>, scalar_prefetch = 0 : i64, scratch_operands = 1 : i64, tpu.core_type = #tpu.core_type<tc>, window_params = [{transform_indices = @transform_0, window_bounds = array<i64: 1, 4, 9, 9, 128>}, {pipeline_mode = #tpu.pipeline_mode<synchronous>, transform_indices = @transform_1, window_bounds = array<i64: 1152, 128>}, {pipeline_mode = #tpu.pipeline_mode<synchronous>, transform_indices = @transform_2, window_bounds = array<i64: 1, 128>}, {pipeline_mode = #tpu.pipeline_mode<synchronous>, transform_indices = @transform_3, window_bounds = array<i64: 1, 128>}, {pipeline_mode = #tpu.pipeline_mode<synchronous>, transform_indices = @transform_4, window_bounds = array<i64: 1152, 128>}, {pipeline_mode = #tpu.pipeline_mode<synchronous>, transform_indices = @transform_5, window_bounds = array<i64: 1, 128>}, {pipeline_mode = #tpu.pipeline_mode<synchronous>, transform_indices = @transform_6, window_bounds = array<i64: 1, 128>}, {pipeline_mode = #tpu.pipeline_mode<synchronous>, transform_indices = @transform_7, window_bounds = array<i64: 128, 128>}, {pipeline_mode = #tpu.pipeline_mode<synchronous>, transform_indices = @transform_8, window_bounds = array<i64: 1, 128>}, {pipeline_mode = #tpu.pipeline_mode<synchronous>, transform_indices = @transform_9, window_bounds = array<i64: 1, 128>}, {transform_indices = @transform_10, window_bounds = array<i64: 1, 64, 128>}]} {
    %c0 = arith.constant 0 : index
    %c0_0 = arith.constant 0 : index
    %c0_1 = arith.constant 0 : index
    %c0_2 = arith.constant 0 : index
    %c0_3 = arith.constant 0 : index
    %0 = vector.load %arg1[%c0, %c0_0, %c0_1, %c0_2, %c0_3] : memref<1x4x9x9x128xf32, #tpu.memory_space<vmem>>, vector<1x1x8x8x128xf32>
    %1 = vector.shape_cast %0 : vector<1x1x8x8x128xf32> to vector<8x8x128xf32>
    %2 = vector.shape_cast %1 : vector<8x8x128xf32> to vector<64x128xf32>
    %c0_4 = arith.constant 0 : index
    %c1 = arith.constant 1 : index
    %c0_5 = arith.constant 0 : index
    %c0_6 = arith.constant 0 : index
    %c0_7 = arith.constant 0 : index
    %3 = vector.load %arg1[%c0_4, %c1, %c0_5, %c0_6, %c0_7] : memref<1x4x9x9x128xf32, #tpu.memory_space<vmem>>, vector<1x1x8x8x128xf32>
    %4 = vector.shape_cast %3 : vector<1x1x8x8x128xf32> to vector<8x8x128xf32>
    %5 = vector.shape_cast %4 : vector<8x8x128xf32> to vector<64x128xf32>
    %c0_8 = arith.constant 0 : index
    %c0_9 = arith.constant 0 : index
    %c0_10 = arith.constant 0 : index
    %c1_11 = arith.constant 1 : index
    %c0_12 = arith.constant 0 : index
    %6 = vector.load %arg1[%c0_8, %c0_9, %c0_10, %c1_11, %c0_12] : memref<1x4x9x9x128xf32, #tpu.memory_space<vmem>>, vector<1x1x8x8x128xf32>
    %7 = vector.shape_cast %6 : vector<1x1x8x8x128xf32> to vector<8x8x128xf32>
    %8 = vector.shape_cast %7 : vector<8x8x128xf32> to vector<64x128xf32>
    %c0_13 = arith.constant 0 : index
    %c2 = arith.constant 2 : index
    %c0_14 = arith.constant 0 : index
    %c0_15 = arith.constant 0 : index
    %c0_16 = arith.constant 0 : index
    %9 = vector.load %arg1[%c0_13, %c2, %c0_14, %c0_15, %c0_16] : memref<1x4x9x9x128xf32, #tpu.memory_space<vmem>>, vector<1x1x8x8x128xf32>
    %10 = vector.shape_cast %9 : vector<1x1x8x8x128xf32> to vector<8x8x128xf32>
    %11 = vector.shape_cast %10 : vector<8x8x128xf32> to vector<64x128xf32>
    %c0_17 = arith.constant 0 : index
    %c3 = arith.constant 3 : index
    %c0_18 = arith.constant 0 : index
    %c0_19 = arith.constant 0 : index
    %c0_20 = arith.constant 0 : index
    %12 = vector.load %arg1[%c0_17, %c3, %c0_18, %c0_19, %c0_20] : memref<1x4x9x9x128xf32, #tpu.memory_space<vmem>>, vector<1x1x8x8x128xf32>
    %13 = vector.shape_cast %12 : vector<1x1x8x8x128xf32> to vector<8x8x128xf32>
    %14 = vector.shape_cast %13 : vector<8x8x128xf32> to vector<64x128xf32>
    %c0_21 = arith.constant 0 : index
    %c2_22 = arith.constant 2 : index
    %c0_23 = arith.constant 0 : index
    %c1_24 = arith.constant 1 : index
    %c0_25 = arith.constant 0 : index
    %15 = vector.load %arg1[%c0_21, %c2_22, %c0_23, %c1_24, %c0_25] : memref<1x4x9x9x128xf32, #tpu.memory_space<vmem>>, vector<1x1x8x8x128xf32>
    %16 = vector.shape_cast %15 : vector<1x1x8x8x128xf32> to vector<8x8x128xf32>
    %17 = vector.shape_cast %16 : vector<8x8x128xf32> to vector<64x128xf32>
    %c0_26 = arith.constant 0 : index
    %c0_27 = arith.constant 0 : index
    %c1_28 = arith.constant 1 : index
    %c0_29 = arith.constant 0 : index
    %c0_30 = arith.constant 0 : index
    %18 = vector.load %arg1[%c0_26, %c0_27, %c1_28, %c0_29, %c0_30] : memref<1x4x9x9x128xf32, #tpu.memory_space<vmem>>, vector<1x1x8x8x128xf32>
    %19 = vector.shape_cast %18 : vector<1x1x8x8x128xf32> to vector<8x8x128xf32>
    %20 = vector.shape_cast %19 : vector<8x8x128xf32> to vector<64x128xf32>
    %c0_31 = arith.constant 0 : index
    %c1_32 = arith.constant 1 : index
    %c1_33 = arith.constant 1 : index
    %c0_34 = arith.constant 0 : index
    %c0_35 = arith.constant 0 : index
    %21 = vector.load %arg1[%c0_31, %c1_32, %c1_33, %c0_34, %c0_35] : memref<1x4x9x9x128xf32, #tpu.memory_space<vmem>>, vector<1x1x8x8x128xf32>
    %22 = vector.shape_cast %21 : vector<1x1x8x8x128xf32> to vector<8x8x128xf32>
    %23 = vector.shape_cast %22 : vector<8x8x128xf32> to vector<64x128xf32>
    %c0_36 = arith.constant 0 : index
    %c0_37 = arith.constant 0 : index
    %c1_38 = arith.constant 1 : index
    %c1_39 = arith.constant 1 : index
    %c0_40 = arith.constant 0 : index
    %24 = vector.load %arg1[%c0_36, %c0_37, %c1_38, %c1_39, %c0_40] : memref<1x4x9x9x128xf32, #tpu.memory_space<vmem>>, vector<1x1x8x8x128xf32>
    %25 = vector.shape_cast %24 : vector<1x1x8x8x128xf32> to vector<8x8x128xf32>
    %26 = vector.shape_cast %25 : vector<8x8x128xf32> to vector<64x128xf32>
    %27 = tpu.concatenate %2, %5, %8, %11, %14, %17, %20, %23, %26 in 1 : vector<64x128xf32>, vector<64x128xf32>, vector<64x128xf32>, vector<64x128xf32>, vector<64x128xf32>, vector<64x128xf32>, vector<64x128xf32>, vector<64x128xf32>, vector<64x128xf32> -> vector<64x1152xf32>
    %c0_41 = arith.constant 0 : index
    %c0_42 = arith.constant 0 : index
    %28 = vector.load %arg2[%c0_41, %c0_42] : memref<1152x128xf32, #tpu.memory_space<vmem>>, vector<1152x128xf32>
    %cst = arith.constant dense<0.000000e+00> : vector<64x128xf32>
    %29 = tpu.matmul %27, %28, %cst {dimension_numbers = #tpu.dot_dimension_numbers<[1], [0], [0], [1], [0, 0, 1, 1], [], []>} : vector<64x1152xf32>, vector<1152x128xf32>, vector<64x128xf32> -> vector<64x128xf32>
    %c0_43 = arith.constant 0 : index
    %c0_44 = arith.constant 0 : index
    %30 = vector.load %arg3[%c0_43, %c0_44] : memref<1x128xf32, #tpu.memory_space<vmem>>, vector<1x128xf32>
    %31 = vector.broadcast %30 : vector<1x128xf32> to vector<64x128xf32>
    %32 = arith.mulf %29, %31 : vector<64x128xf32>
    %c0_45 = arith.constant 0 : index
    %c0_46 = arith.constant 0 : index
    %33 = vector.load %arg4[%c0_45, %c0_46] : memref<1x128xf32, #tpu.memory_space<vmem>>, vector<1x128xf32>
    %34 = vector.broadcast %33 : vector<1x128xf32> to vector<64x128xf32>
    %35 = arith.addf %32, %34 : vector<64x128xf32>
    %cst_47 = arith.constant 0.000000e+00 : f32
    %36 = vector.broadcast %cst_47 : f32 to vector<64x128xf32>
    %37 = arith.maximumf %35, %36 : vector<64x128xf32>
    %cst_48 = arith.constant 0.000000e+00 : f32
    %38 = vector.broadcast %cst_48 : f32 to vector<1x10x128xf32>
    %cst_49 = arith.constant 0.000000e+00 : f32
    %39 = vector.broadcast %cst_49 : f32 to vector<10x1x128xf32>
    %c0_50 = arith.constant 0 : index
    %c0_51 = arith.constant 0 : index
    %c0_52 = arith.constant 0 : index
    %40 = vector.load %arg12[%c0_50, %c0_51, %c0_52] : memref<10x10x128xf32, #tpu.memory_space<vmem>>, vector<1x10x128xf32>
    tpu.vector_store %arg12[%c0_50, %c0_51, %c0_52], %38 {strides = array<i32>} : memref<10x10x128xf32, #tpu.memory_space<vmem>>, vector<1x10x128xf32>,
    %c9 = arith.constant 9 : index
    %c0_53 = arith.constant 0 : index
    %c0_54 = arith.constant 0 : index
    %41 = vector.load %arg12[%c9, %c0_53, %c0_54] : memref<10x10x128xf32, #tpu.memory_space<vmem>>, vector<1x10x128xf32>
    tpu.vector_store %arg12[%c9, %c0_53, %c0_54], %38 {strides = array<i32>} : memref<10x10x128xf32, #tpu.memory_space<vmem>>, vector<1x10x128xf32>,
    %c0_55 = arith.constant 0 : index
    %c0_56 = arith.constant 0 : index
    %c0_57 = arith.constant 0 : index
    %42 = vector.load %arg12[%c0_55, %c0_56, %c0_57] : memref<10x10x128xf32, #tpu.memory_space<vmem>>, vector<10x1x128xf32>
    tpu.vector_store %arg12[%c0_55, %c0_56, %c0_57], %39 {strides = array<i32>} : memref<10x10x128xf32, #tpu.memory_space<vmem>>, vector<10x1x128xf32>,
    %c0_58 = arith.constant 0 : index
    %c9_59 = arith.constant 9 : index
    %c0_60 = arith.constant 0 : index
    %43 = vector.load %arg12[%c0_58, %c9_59, %c0_60] : memref<10x10x128xf32, #tpu.memory_space<vmem>>, vector<10x1x128xf32>
    tpu.vector_store %arg12[%c0_58, %c9_59, %c0_60], %39 {strides = array<i32>} : memref<10x10x128xf32, #tpu.memory_space<vmem>>, vector<10x1x128xf32>,
    %44 = vector.shape_cast %37 : vector<64x128xf32> to vector<8x8x128xf32>
    %c1_61 = arith.constant 1 : index
    %c1_62 = arith.constant 1 : index
    %c0_63 = arith.constant 0 : index
    %45 = vector.load %arg12[%c1_61, %c1_62, %c0_63] : memref<10x10x128xf32, #tpu.memory_space<vmem>>, vector<8x8x128xf32>
    tpu.vector_store %arg12[%c1_61, %c1_62, %c0_63], %44 {strides = array<i32>} : memref<10x10x128xf32, #tpu.memory_space<vmem>>, vector<8x8x128xf32>,
    %c0_64 = arith.constant 0 : index
    %c0_65 = arith.constant 0 : index
    %c0_66 = arith.constant 0 : index
    %46 = vector.load %arg12[%c0_64, %c0_65, %c0_66] : memref<10x10x128xf32, #tpu.memory_space<vmem>>, vector<8x8x128xf32>
    %47 = vector.shape_cast %46 : vector<8x8x128xf32> to vector<64x128xf32>
    %c0_67 = arith.constant 0 : index
    %c1_68 = arith.constant 1 : index
    %c0_69 = arith.constant 0 : index
    %48 = vector.load %arg12[%c0_67, %c1_68, %c0_69] : memref<10x10x128xf32, #tpu.memory_space<vmem>>, vector<8x8x128xf32>
    %49 = vector.shape_cast %48 : vector<8x8x128xf32> to vector<64x128xf32>
    %c0_70 = arith.constant 0 : index
    %c2_71 = arith.constant 2 : index
    %c0_72 = arith.constant 0 : index
    %50 = vector.load %arg12[%c0_70, %c2_71, %c0_72] : memref<10x10x128xf32, #tpu.memory_space<vmem>>, vector<8x8x128xf32>
    %51 = vector.shape_cast %50 : vector<8x8x128xf32> to vector<64x128xf32>
    %c1_73 = arith.constant 1 : index
    %c0_74 = arith.constant 0 : index
    %c0_75 = arith.constant 0 : index
    %52 = vector.load %arg12[%c1_73, %c0_74, %c0_75] : memref<10x10x128xf32, #tpu.memory_space<vmem>>, vector<8x8x128xf32>
    %53 = vector.shape_cast %52 : vector<8x8x128xf32> to vector<64x128xf32>
    %c1_76 = arith.constant 1 : index
    %c1_77 = arith.constant 1 : index
    %c0_78 = arith.constant 0 : index
    %54 = vector.load %arg12[%c1_76, %c1_77, %c0_78] : memref<10x10x128xf32, #tpu.memory_space<vmem>>, vector<8x8x128xf32>
    %55 = vector.shape_cast %54 : vector<8x8x128xf32> to vector<64x128xf32>
    %c1_79 = arith.constant 1 : index
    %c2_80 = arith.constant 2 : index
    %c0_81 = arith.constant 0 : index
    %56 = vector.load %arg12[%c1_79, %c2_80, %c0_81] : memref<10x10x128xf32, #tpu.memory_space<vmem>>, vector<8x8x128xf32>
    %57 = vector.shape_cast %56 : vector<8x8x128xf32> to vector<64x128xf32>
    %c2_82 = arith.constant 2 : index
    %c0_83 = arith.constant 0 : index
    %c0_84 = arith.constant 0 : index
    %58 = vector.load %arg12[%c2_82, %c0_83, %c0_84] : memref<10x10x128xf32, #tpu.memory_space<vmem>>, vector<8x8x128xf32>
    %59 = vector.shape_cast %58 : vector<8x8x128xf32> to vector<64x128xf32>
    %c2_85 = arith.constant 2 : index
    %c1_86 = arith.constant 1 : index
    %c0_87 = arith.constant 0 : index
    %60 = vector.load %arg12[%c2_85, %c1_86, %c0_87] : memref<10x10x128xf32, #tpu.memory_space<vmem>>, vector<8x8x128xf32>
    %61 = vector.shape_cast %60 : vector<8x8x128xf32> to vector<64x128xf32>
    %c2_88 = arith.constant 2 : index
    %c2_89 = arith.constant 2 : index
    %c0_90 = arith.constant 0 : index
    %62 = vector.load %arg12[%c2_88, %c2_89, %c0_90] : memref<10x10x128xf32, #tpu.memory_space<vmem>>, vector<8x8x128xf32>
    %63 = vector.shape_cast %62 : vector<8x8x128xf32> to vector<64x128xf32>
    %64 = tpu.concatenate %47, %49, %51, %53, %55, %57, %59, %61, %63 in 1 : vector<64x128xf32>, vector<64x128xf32>, vector<64x128xf32>, vector<64x128xf32>, vector<64x128xf32>, vector<64x128xf32>, vector<64x128xf32>, vector<64x128xf32>, vector<64x128xf32> -> vector<64x1152xf32>
    %c0_91 = arith.constant 0 : index
    %c0_92 = arith.constant 0 : index
    %65 = vector.load %arg5[%c0_91, %c0_92] : memref<1152x128xf32, #tpu.memory_space<vmem>>, vector<1152x128xf32>
    %cst_93 = arith.constant dense<0.000000e+00> : vector<64x128xf32>
    %66 = tpu.matmul %64, %65, %cst_93 {dimension_numbers = #tpu.dot_dimension_numbers<[1], [0], [0], [1], [0, 0, 1, 1], [], []>} : vector<64x1152xf32>, vector<1152x128xf32>, vector<64x128xf32> -> vector<64x128xf32>
    %c0_94 = arith.constant 0 : index
    %c0_95 = arith.constant 0 : index
    %67 = vector.load %arg6[%c0_94, %c0_95] : memref<1x128xf32, #tpu.memory_space<vmem>>, vector<1x128xf32>
    %68 = vector.broadcast %67 : vector<1x128xf32> to vector<64x128xf32>
    %69 = arith.mulf %66, %68 : vector<64x128xf32>
    %c0_96 = arith.constant 0 : index
    %c0_97 = arith.constant 0 : index
    %70 = vector.load %arg7[%c0_96, %c0_97] : memref<1x128xf32, #tpu.memory_space<vmem>>, vector<1x128xf32>
    %71 = vector.broadcast %70 : vector<1x128xf32> to vector<64x128xf32>
    %72 = arith.addf %69, %71 : vector<64x128xf32>
    %c0_98 = arith.constant 0 : index
    %c3_99 = arith.constant 3 : index
    %c0_100 = arith.constant 0 : index
    %c0_101 = arith.constant 0 : index
    %c0_102 = arith.constant 0 : index
    %73 = vector.load %arg1[%c0_98, %c3_99, %c0_100, %c0_101, %c0_102] : memref<1x4x9x9x128xf32, #tpu.memory_space<vmem>>, vector<1x1x8x8x128xf32>
    %74 = vector.shape_cast %73 : vector<1x1x8x8x128xf32> to vector<8x8x128xf32>
    %75 = vector.shape_cast %74 : vector<8x8x128xf32> to vector<64x128xf32>
    %c0_103 = arith.constant 0 : index
    %c0_104 = arith.constant 0 : index
    %76 = vector.load %arg8[%c0_103, %c0_104] : memref<128x128xf32, #tpu.memory_space<vmem>>, vector<128x128xf32>
    %cst_105 = arith.constant dense<0.000000e+00> : vector<64x128xf32>
    %77 = tpu.matmul %75, %76, %cst_105 {dimension_numbers = #tpu.dot_dimension_numbers<[1], [0], [0], [1], [0, 0, 1, 1], [], []>} : vector<64x128xf32>, vector<128x128xf32>, vector<64x128xf32> -> vector<64x128xf32>
    %c0_106 = arith.constant 0 : index
    %c0_107 = arith.constant 0 : index
    %78 = vector.load %arg9[%c0_106, %c0_107] : memref<1x128xf32, #tpu.memory_space<vmem>>, vector<1x128xf32>
    %79 = vector.broadcast %78 : vector<1x128xf32> to vector<64x128xf32>
    %80 = arith.mulf %77, %79 : vector<64x128xf32>
    %c0_108 = arith.constant 0 : index
    %c0_109 = arith.constant 0 : index
    %81 = vector.load %arg10[%c0_108, %c0_109] : memref<1x128xf32, #tpu.memory_space<vmem>>, vector<1x128xf32>
    %82 = vector.broadcast %81 : vector<1x128xf32> to vector<64x128xf32>
    %83 = arith.addf %80, %82 : vector<64x128xf32>
    %84 = arith.addf %72, %83 : vector<64x128xf32>
    %cst_110 = arith.constant 0.000000e+00 : f32
    %85 = vector.broadcast %cst_110 : f32 to vector<64x128xf32>
    %86 = arith.maximumf %84, %85 : vector<64x128xf32>
    %87 = vector.shape_cast %86 : vector<64x128xf32> to vector<1x64x128xf32>
    %c0_111 = arith.constant 0 : index
    %c0_112 = arith.constant 0 : index
    %c0_113 = arith.constant 0 : index
    %88 = vector.load %arg11[%c0_111, %c0_112, %c0_113] : memref<1x64x128xf32, #tpu.memory_space<vmem>>, vector<1x64x128xf32>
    tpu.vector_store %arg11[%c0_111, %c0_112, %c0_113], %87 {strides = array<i32>} : memref<1x64x128xf32, #tpu.memory_space<vmem>>, vector<1x64x128xf32>,
    return
  }
  func.func @transform_0(%arg0: i32) -> (i32, i32, i32, i32, i32) {
    %c0_i32 = arith.constant 0 : i32
    %c0_i32_0 = arith.constant 0 : i32
    %c0_i32_1 = arith.constant 0 : i32
    %c0_i32_2 = arith.constant 0 : i32
    %c0_i32_3 = arith.constant 0 : i32
    return %arg0, %c0_i32, %c0_i32_0, %c0_i32_1, %c0_i32_2 : i32, i32, i32, i32, i32
  }
  func.func @transform_1(%arg0: i32) -> (i32, i32) {
    %c0_i32 = arith.constant 0 : i32
    %c0_i32_0 = arith.constant 0 : i32
    %c0_i32_1 = arith.constant 0 : i32
    return %c0_i32, %c0_i32_0 : i32, i32
  }
  func.func @transform_2(%arg0: i32) -> (i32, i32) {
    %c0_i32 = arith.constant 0 : i32
    %c0_i32_0 = arith.constant 0 : i32
    %c0_i32_1 = arith.constant 0 : i32
    return %c0_i32, %c0_i32_0 : i32, i32
  }
  func.func @transform_3(%arg0: i32) -> (i32, i32) {
    %c0_i32 = arith.constant 0 : i32
    %c0_i32_0 = arith.constant 0 : i32
    %c0_i32_1 = arith.constant 0 : i32
    return %c0_i32, %c0_i32_0 : i32, i32
  }
  func.func @transform_4(%arg0: i32) -> (i32, i32) {
    %c0_i32 = arith.constant 0 : i32
    %c0_i32_0 = arith.constant 0 : i32
    %c0_i32_1 = arith.constant 0 : i32
    return %c0_i32, %c0_i32_0 : i32, i32
  }
  func.func @transform_5(%arg0: i32) -> (i32, i32) {
    %c0_i32 = arith.constant 0 : i32
    %c0_i32_0 = arith.constant 0 : i32
    %c0_i32_1 = arith.constant 0 : i32
    return %c0_i32, %c0_i32_0 : i32, i32
  }
  func.func @transform_6(%arg0: i32) -> (i32, i32) {
    %c0_i32 = arith.constant 0 : i32
    %c0_i32_0 = arith.constant 0 : i32
    %c0_i32_1 = arith.constant 0 : i32
    return %c0_i32, %c0_i32_0 : i32, i32
  }
  func.func @transform_7(%arg0: i32) -> (i32, i32) {
    %c0_i32 = arith.constant 0 : i32
    %c0_i32_0 = arith.constant 0 : i32
    %c0_i32_1 = arith.constant 0 : i32
    return %c0_i32, %c0_i32_0 : i32, i32
  }
  func.func @transform_8(%arg0: i32) -> (i32, i32) {
    %c0_i32 = arith.constant 0 : i32
    %c0_i32_0 = arith.constant 0 : i32
    %c0_i32_1 = arith.constant 0 : i32
    return %c0_i32, %c0_i32_0 : i32, i32
  }
  func.func @transform_9(%arg0: i32) -> (i32, i32) {
    %c0_i32 = arith.constant 0 : i32
    %c0_i32_0 = arith.constant 0 : i32
    %c0_i32_1 = arith.constant 0 : i32
    return %c0_i32, %c0_i32_0 : i32, i32
  }
  func.func @transform_10(%arg0: i32) -> (i32, i32, i32) {
    %c0_i32 = arith.constant 0 : i32
    %c0_i32_0 = arith.constant 0 : i32
    %c0_i32_1 = arith.constant 0 : i32
    return %arg0, %c0_i32, %c0_i32_0 : i32, i32, i32
  }
}

</mosaic_0001>

<bundles_post_ra>
// kernel: tpu_custom_call.1
= control target key start
LH: loop header
LB: loop body
LE: loop exit
PB: predicated region body
PF: predicated region fallthrough
CT: control target
= control target key end

     0   :  { %s4392_s0 = inlined_call_operand.vmem [shape: f32[2,4,9,9,128], index: 0, kind: input, shape index: {}]   ;;  %s4393_s1 = inlined_call_operand.vmem [shape: f32[1152,128], index: 1, kind: input, shape index: {}]   ;;  %s4394_s2 = inlined_call_operand.vmem [shape: f32[1,128], index: 2, kind: input, shape index: {}]   ;;  %s4395_s3 = inlined_call_operand.vmem [shape: f32[1,128], index: 3, kind: input, shape index: {}]   ;;  %s4396_s4 = inlined_call_operand.hbm [shape: f32[1152,128], index: 4, kind: input, shape index: {}]   ;;  %s4397_s5 = inlined_call_operand.vmem [shape: f32[1,128], index: 5, kind: input, shape index: {}]   ;;  %s4398_s6 = inlined_call_operand.vmem [shape: f32[1,128], index: 6, kind: input, shape index: {}]   ;;  %s4399_s7 = inlined_call_operand.vmem [shape: f32[128,128], index: 7, kind: input, shape index: {}]   ;;  %s4400_s8 = inlined_call_operand.vmem [shape: f32[1,128], index: 8, kind: input, shape index: {}]   ;;  %s4401_s9 = inlined_call_operand.vmem [shape: f32[1,128], index: 9, kind: input, shape index: {}]   ;;  %s4402_s10 = inlined_call_operand.hbm [shape: f32[2,64,128], index: 10, kind: output, shape index: {}]  }
   0x1   :  { %4404 = sst [smem:[#allocation17_spill]] %s4396_s4 }
   0x2   :  { %15 = vsyncpa [#allocation4], 0 }
   0x3   :  { %16 = vsyncpa [#allocation5], 0 }
   0x4   :  { %18 = vsyncpa [#allocation5 + $0x1], 0  ;;  %s3212_s13 = smov 0   ;;  %s3214_s14 = smov 0  }
   0x5   :  { %s3216_s15 = smov 0   ;;  %s3218_s16 = smov 0  }
   0x6 LB: > { %s3233_s17 = sadd.s32 4294967295, %s3148_s16   ;;  %s2234_s18 = sadd.s32 4294967294, %s3148_s16   ;;  %s3148_s16 = sphi %s3218_s16, %s4431_s16   ;;  %s3144_s15 = sphi %s3216_s15, %s4430_s15   ;;  %s3140_s14 = sphi %s3214_s14, %s4429_s14   ;;  %s3136_s13 = sphi %s3212_s13, %s4428_s13  }
   0x7   : > { %s3237_s19 = sadd.s32 1, %s3148_s16   ;;  %s246_s20 = sadd.s32 1, %s3144_s15 }
   0x8   : > { %s243_s21 = ssub.s32 %s3148_s16, %s3237_s19  ;;  %p256_p0 = scmp.ne.s32.totalorder %s3144_s15, %s3140_s14 }
   0x9   : > { %p244_p1 = scmp.eq.s32.totalorder %s243_s21, 0  ;;  %p257_p2 = scmp.eq.s32.totalorder %s3233_s17, 1 }
   0xa   : > { %p262_p3 = scmp.ne.s32.totalorder %s3140_s14, %s3136_s13  ;;  %p263_p4 = scmp.eq.s32.totalorder %s2234_s18, 1 }
   0xb   : > { %s3248_s22 = scalar_select %p244_p1, %s3144_s15, %s246_s20  }
   0xc   : > { %p3250_p5 = por %p257_p2, %p256_p0  ;;  %p3254_p6 = por %p263_p4, %p262_p3 }
   0xd   : > { %p2235_p7 = scmp.ge.s32.totalorder %s3148_s16, 1  ;;  %p270_p8 = scmp.lt.s32.totalorder %s3148_s16, 3 }
   0xe   : > { %s4406_s24 = scalar_select %p3254_p6, 1, 0 }
   0xf   : > { %p3017_p9 = scmp.eq.s32.totalorder %s3233_s17, 0  ;;  %p3261_p10 = pnand %p2235_p7, %p270_p8 }
  0x10   : > { %s3150_s26 = smov [#allocation3]  }
  0x11   : > { %s291_s27 = sshll.u32 %s3150_s26, 4  ;;  %p3009_p11 = pneg %p3261_p10  ;;  %s292_s27 = int_to_ptr.vmem [resolvable:$true] %s291_s27 }
  0x12   : > { %s3069_s28 = scalar_lea.vmem %s292_s27, 18432  ;;  %p3077_p3 = scmp.lt.s32.totalorder %s292_s27, %s292_s27 }
  0x13   : > { %p3010_p12 = pnand %p3017_p9, %p3009_p11  ;;  %p3070_p0 = scmp.ne.s32.totalorder %s292_s27, %s3069_s28 }
  0x14   : > { %p3078_p4 = scmp.lt.s32.totalorder %s3069_s28, %s3069_s28 }
  0x15   : > { %p3060_p13 = pneg %p3010_p12 }
  0x16   : > { %p3079_p6 = por %p3078_p4, %p3077_p3 }
  0x17   : > { %p3072_p1 = pnand %p3070_p0, %p3060_p13 }
  0x19   : > { %p3073_p2 = pneg %p3072_p1 }
  0x1b   : > { %p3080_p7 = pnand %p3079_p6, %p3073_p2 }
  0x1d   : > { %3083 = shalt.err (!%p3080_p7)
}
  0x1e   : > { %s3151_s29 = smov 128   ;;  %s3152_s30 = smov 8  }
  0x1f   : > { %s4408_s4 = sld [smem:[#allocation17_spill]] }
  0x21   : > { %330 = sbr.rel (%p3261_p10) target bundleno = 698 (0x2ba), region = 60 }
  0x25   : > { %3012 = dma.hbm_to_vmem [thread:$0]  (!%p3010_p12), %s4408_s4, 18432, %s292_s27, [#allocation4], %s3151_s29, %s3151_s29, %s3152_s30  }
  0x26   : > { %3127 = dma.done.wait (%p3017_p9), [#allocation4], 18432  }
  0x27   : > { %3129 = vsyncadd (%p3017_p9), [#allocation4], 4294948864  ;;  %v481_v0 = vld [vmem:[%s4393_s1 + $0xf8] sm:$0xff]  ;;  %v480_v4 = vld [vmem:[%s4393_s1 + $0xf0] sm:$0xff]  ;;  %p368_p6 = scmp.lt.s32.totalorder %s3233_s17, 1  ;;  %s365_s25 = sand.u32 1, %s3140_s14  }
  0x28   : > { %v513_v1 = vld [vmem:[%s4393_s1 + $0x1f8] sm:$0xff]  ;;  %2318 = vmatprep.subr.mxu0 %v481_v0  ;;  %v512_v5 = vld [vmem:[%s4393_s1 + $0x1f0] sm:$0xff]  ;;  %v479_v8 = vld [vmem:[%s4393_s1 + $0xe8] sm:$0xff]  ;;  %s2240_s30 = sshll.u32 %s365_s25, 6  ;;  %s2317_s18 = sshll.u32 %s3233_s17, 10 }
  0x29   : > { %v465_v2 = vld [vmem:[%s4393_s1 + $0x78] sm:$0xff]  ;;  %2374 = vmatprep.subr.mxu1 %v513_v1  ;;  %v464_v6 = vld [vmem:[%s4393_s1 + $0x70] sm:$0xff]  ;;  %v511_v9 = vld [vmem:[%s4393_s1 + $0x1e8] sm:$0xff]  ;;  %s3408_s27 = scalar_select %p368_p6, %s3233_s17, 1 }
  0x2a   : > { %v497_v3 = vld [vmem:[%s4393_s1 + $0x178] sm:$0xff]  ;;  %2319 = vmatpush3.msra.mxu0 %v465_v2  ;;  %v496_v7 = vld [vmem:[%s4393_s1 + $0x170] sm:$0xff]  ;;  %v463_v10 = vld [vmem:[%s4393_s1 + $0x68] sm:$0xff]  ;;  %s4287_s12 = scalar_lea.vmem [#allocation6], %s2240_s30  ;;  %s4344_s21 = scalar_lea.hbm %s4402_s10, %s2317_s18 }
  0x2b   : > { %2375 = vmatpush3.msra.mxu1 %v497_v3  ;;  %2320 = vmatprep.subr.mxu0 %v480_v4  ;;  %v495_v11 = vld [vmem:[%s4393_s1 + $0x168] sm:$0xff]  ;;  %v478_v12 = vld [vmem:[%s4393_s1 + $0xe0] sm:$0xff]  ;;  %v477_v16 = vld [vmem:[%s4393_s1 + $0xd8] sm:$0xff]  ;;  %s3002_s26 = smul.u32 576, %s3408_s27  ;;  %s4352_s28 = scalar_lea.sflag [#allocation5], %s365_s25 }
  0x2c   : > { %2376 = vmatprep.subr.mxu1 %v512_v5  ;;  %2321 = vmatpush3.msra.mxu0 %v464_v6  ;;  %v510_v13 = vld [vmem:[%s4393_s1 + $0x1e0] sm:$0xff]  ;;  %v509_v17 = vld [vmem:[%s4393_s1 + $0x1d8] sm:$0xff]  ;;  %v476_v20 = vld [vmem:[%s4393_s1 + $0xd0] sm:$0xff]  ;;  %s3154_s11 = smov [#allocation6]  }
  0x2d   : > { %2377 = vmatpush3.msra.mxu1 %v496_v7  ;;  %2322 = vmatprep.subr.mxu0 %v479_v8  ;;  %v462_v14 = vld [vmem:[%s4393_s1 + $0x60] sm:$0xff]  ;;  %v461_v18 = vld [vmem:[%s4393_s1 + $0x58] sm:$0xff]  ;;  %v508_v21 = vld [vmem:[%s4393_s1 + $0x1d0] sm:$0xff]  ;;  %s3462_s4 = scalar_lea.vmem %s4392_s0, %s3002_s26  ;;  %s3088_s29 = sshll.u32 %s3154_s11, 4  ;;  %s3089_s29 = int_to_ptr.vmem [resolvable:$false] %s3088_s29 }
  0x2e   : > { %2378 = vmatprep.subr.mxu1 %v511_v9  ;;  %v494_v15 = vld [vmem:[%s4393_s1 + $0x160] sm:$0xff]  ;;  %2323 = vmatpush3.msra.mxu0 %v463_v10  ;;  %v493_v19 = vld [vmem:[%s4393_s1 + $0x158] sm:$0xff]  ;;  %v460_v22 = vld [vmem:[%s4393_s1 + $0x50] sm:$0xff]  ;;  %s3090_s26 = scalar_lea.vmem %s3089_s29, 2048 }
  0x2f   : > { %2379 = vmatpush3.msra.mxu1 %v495_v11  ;;  %2324 = vmatprep.subr.mxu0 %v478_v12  ;;  %v492_v23 = vld [vmem:[%s4393_s1 + $0x150] sm:$0xff]  ;;  %v475_v24 = vld [vmem:[%s4393_s1 + $0xc8] sm:$0xff]  ;;  %v474_v28 = vld [vmem:[%s4393_s1 + $0xc0] sm:$0xff] }
  0x30   : > { %2380 = vmatprep.subr.mxu1 %v510_v13  ;;  %2325 = vmatpush3.msra.mxu0 %v462_v14  ;;  %v507_v25 = vld [vmem:[%s4393_s1 + $0x1c8] sm:$0xff]  ;;  %v506_v29 = vld [vmem:[%s4393_s1 + $0x1c0] sm:$0xff]  ;;  %v473_v32 = vld [vmem:[%s4393_s1 + $0xb8] sm:$0xff] }
  0x31   : > { %2381 = vmatpush3.msra.mxu1 %v494_v15  ;;  %2326 = vmatprep.subr.mxu0 %v477_v16  ;;  %v459_v26 = vld [vmem:[%s4393_s1 + $0x48] sm:$0xff]  ;;  %v458_v30 = vld [vmem:[%s4393_s1 + $0x40] sm:$0xff]  ;;  %v505_v33 = vld [vmem:[%s4393_s1 + $0x1b8] sm:$0xff] }
  0x32   : > { %2382 = vmatprep.subr.mxu1 %v509_v17  ;;  %2327 = vmatpush3.msra.mxu0 %v461_v18  ;;  %v491_v27 = vld [vmem:[%s4393_s1 + $0x148] sm:$0xff]  ;;  %v490_v31 = vld [vmem:[%s4393_s1 + $0x140] sm:$0xff]  ;;  %v457_v34 = vld [vmem:[%s4393_s1 + $0x38] sm:$0xff] }
  0x33   : > { %2383 = vmatpush3.msra.mxu1 %v493_v19  ;;  %2328 = vmatprep.subr.mxu0 %v476_v20  ;;  %v489_v35 = vld [vmem:[%s4393_s1 + $0x138] sm:$0xff]  ;;  %v472_v36 = vld [vmem:[%s4393_s1 + $0xb0] sm:$0xff]  ;;  %v471_v40 = vld [vmem:[%s4393_s1 + $0xa8] sm:$0xff] }
  0x34   : > { %2384 = vmatprep.subr.mxu1 %v508_v21  ;;  %2329 = vmatpush3.msra.mxu0 %v460_v22  ;;  %v504_v37 = vld [vmem:[%s4393_s1 + $0x1b0] sm:$0xff]  ;;  %v503_v41 = vld [vmem:[%s4393_s1 + $0x1a8] sm:$0xff]  ;;  %v470_v44 = vld [vmem:[%s4393_s1 + $0xa0] sm:$0xff] }
  0x35   : > { %2385 = vmatpush3.msra.mxu1 %v492_v23  ;;  %2330 = vmatprep.subr.mxu0 %v475_v24  ;;  %v456_v38 = vld [vmem:[%s4393_s1 + $0x30] sm:$0xff]  ;;  %v455_v42 = vld [vmem:[%s4393_s1 + $0x28] sm:$0xff]  ;;  %v502_v45 = vld [vmem:[%s4393_s1 + $0x1a0] sm:$0xff] }
  0x36   : > { %2386 = vmatprep.subr.mxu1 %v507_v25  ;;  %2331 = vmatpush3.msra.mxu0 %v459_v26  ;;  %v488_v39 = vld [vmem:[%s4393_s1 + $0x130] sm:$0xff]  ;;  %v487_v43 = vld [vmem:[%s4393_s1 + $0x128] sm:$0xff]  ;;  %v454_v46 = vld [vmem:[%s4393_s1 + $0x20] sm:$0xff] }
  0x37   : > { %2387 = vmatpush3.msra.mxu1 %v491_v27  ;;  %2332 = vmatprep.subr.mxu0 %v474_v28  ;;  %v486_v47 = vld [vmem:[%s4393_s1 + $0x120] sm:$0xff]  ;;  %v469_v48 = vld [vmem:[%s4393_s1 + $0x98] sm:$0xff]  ;;  %v468_v52 = vld [vmem:[%s4393_s1 + $0x90] sm:$0xff] }
  0x38   : > { %2388 = vmatprep.subr.mxu1 %v506_v29  ;;  %2333 = vmatpush3.msra.mxu0 %v458_v30  ;;  %v501_v49 = vld [vmem:[%s4393_s1 + $0x198] sm:$0xff]  ;;  %v500_v53 = vld [vmem:[%s4393_s1 + $0x190] sm:$0xff]  ;;  %v467_v56 = vld [vmem:[%s4393_s1 + $0x88] sm:$0xff] }
  0x39   : > { %2389 = vmatpush3.msra.mxu1 %v490_v31  ;;  %2334 = vmatprep.subr.mxu0 %v473_v32  ;;  %v453_v50 = vld [vmem:[%s4393_s1 + $0x18] sm:$0xff]  ;;  %v452_v54 = vld [vmem:[%s4393_s1 + $0x10] sm:$0xff]  ;;  %v499_v57 = vld [vmem:[%s4393_s1 + $0x188] sm:$0xff] }
  0x3a   : > { %2390 = vmatprep.subr.mxu1 %v505_v33  ;;  %2335 = vmatpush3.msra.mxu0 %v457_v34  ;;  %v485_v51 = vld [vmem:[%s4393_s1 + $0x118] sm:$0xff]  ;;  %v484_v55 = vld [vmem:[%s4393_s1 + $0x110] sm:$0xff]  ;;  %v451_v58 = vld [vmem:[%s4393_s1 + $0x8] sm:$0xff] }
  0x3b   : > { %2391 = vmatpush3.msra.mxu1 %v489_v35  ;;  %2336 = vmatprep.subr.mxu0 %v472_v36  ;;  %v483_v59 = vld [vmem:[%s4393_s1 + $0x108] sm:$0xff]  ;;  %v466_v60 = vld [vmem:[%s4393_s1 + $0x80] sm:$0xff]  ;;  %v2242_v63 = vld [vmem:[%s3462_s4 + $0x90] sm:$0xff] }
  0x3c   : > { %2392 = vmatprep.subr.mxu1 %v504_v37  ;;  %2337 = vmatpush3.msra.mxu0 %v456_v38  ;;  %v498_v61 = vld [vmem:[%s4393_s1 + $0x180] sm:$0xff]  ;;  %v545_v4 = vld [vmem:[%s4393_s1 + $0x2f8] sm:$0xff]  ;;  %v544_v8 = vld [vmem:[%s4393_s1 + $0x2f0] sm:$0xff] }
  0x3d   : > { %2393 = vmatpush3.msra.mxu1 %v488_v39  ;;  %2338 = vmatprep.subr.mxu0 %v471_v40  ;;  %v450_v62 = vld [vmem:[%s4393_s1] sm:$0xff]  ;;  %v577_v5 = vld [vmem:[%s4393_s1 + $0x3f8] sm:$0xff]  ;;  %v2251_v9 = vld [vmem:[%s3462_s4 + $0x130] sm:$0xff] }
  0x3e   : > { %2394 = vmatprep.subr.mxu1 %v503_v41  ;;  %2339 = vmatpush3.msra.mxu0 %v455_v42  ;;  %v482_v0 = vld [vmem:[%s4393_s1 + $0x100] sm:$0xff]  ;;  %v529_v6 = vld [vmem:[%s4393_s1 + $0x278] sm:$0xff]  ;;  %v528_v10 = vld [vmem:[%s4393_s1 + $0x270] sm:$0xff] }
  0x3f   : > { %2395 = vmatpush3.msra.mxu1 %v487_v43  ;;  %2340 = vmatprep.subr.mxu0 %v470_v44  ;;  %v2250_v1 = vld [vmem:[%s3462_s4 + $0x120] sm:$0xff]  ;;  %v561_v11 = vld [vmem:[%s4393_s1 + $0x378] sm:$0xff]  ;;  %v3510_v12 = vld [vmem:[%s3462_s4 + $0x10] sm:$0xff] }
  0x40   : > { %2396 = vmatprep.subr.mxu1 %v502_v45  ;;  %2341 = vmatpush3.msra.mxu0 %v454_v46  ;;  %v373_v2 = vld [vmem:[%s3462_s4] sm:$0xff]  ;;  %v3513_v13 = vld [vmem:[%s3462_s4 + $0x11] sm:$0xff]  ;;  %v543_v14 = vld [vmem:[%s4393_s1 + $0x2e8] sm:$0xff] }
  0x41   : > { %2397 = vmatpush3.msra.mxu1 %v486_v47  ;;  %2342 = vmatprep.subr.mxu0 %v469_v48  ;;  %v390_v3 = vld [vmem:[%s3462_s4 + $0x1] sm:$0xff]  ;;  %v576_v15 = vld [vmem:[%s4393_s1 + $0x3f0] sm:$0xff]  ;;  %v541_v26 = vld [vmem:[%s4393_s1 + $0x2d8] sm:$0xff] }
  0x42   : > { %2398 = vmatprep.subr.mxu1 %v501_v49  ;;  %2343 = vmatpush3.msra.mxu0 %v453_v50  ;;  %v3496_v7 = vld [vmem:[%s3462_s4 + $0xa0] sm:$0xff]  ;;  %v527_v16 = vld [vmem:[%s4393_s1 + $0x268] sm:$0xff]  ;;  %v560_v17 = vld [vmem:[%s4393_s1 + $0x370] sm:$0xff] }
  0x43   : > { %2399 = vmatpush3.msra.mxu1 %v485_v51  ;;  %2344 = vmatprep.subr.mxu0 %v468_v52  ;;  %v542_v18 = vld [vmem:[%s4393_s1 + $0x2e0] sm:$0xff]  ;;  %v575_v19 = vld [vmem:[%s4393_s1 + $0x3e8] sm:$0xff]  ;;  %v3536_v20 = vld [vmem:[%s3462_s4 + $0xb0] sm:$0xff] }
  0x44   : > { %2400 = vmatprep.subr.mxu1 %v500_v53  ;;  %2345 = vmatpush3.msra.mxu0 %v452_v54  ;;  %v2252_v21 = vld [vmem:[%s3462_s4 + $0x140] sm:$0xff]  ;;  %v559_v23 = vld [vmem:[%s4393_s1 + $0x368] sm:$0xff]  ;;  %v525_v28 = vld [vmem:[%s4393_s1 + $0x258] sm:$0xff] }
  0x45   : > { %2401 = vmatpush3.msra.mxu1 %v484_v55  ;;  %2346 = vmatprep.subr.mxu0 %v467_v56  ;;  %v526_v22 = vld [vmem:[%s4393_s1 + $0x260] sm:$0xff]  ;;  %v540_v30 = vld [vmem:[%s4393_s1 + $0x2d0] sm:$0xff]  ;;  %v573_v31 = vld [vmem:[%s4393_s1 + $0x3d8] sm:$0xff] }
  0x46   : > { %2402 = vmatprep.subr.mxu1 %v499_v57  ;;  %2347 = vmatpush3.msra.mxu0 %v451_v58  ;;  %v3546_v24 = vld [vmem:[%s3462_s4 + $0x20] sm:$0xff]  ;;  %v2253_v33 = vld [vmem:[%s3462_s4 + $0x150] sm:$0xff]  ;;  %v557_v35 = vld [vmem:[%s4393_s1 + $0x358] sm:$0xff] }
  0x47   : > { %2403 = vmatpush3.msra.mxu1 %v483_v59  ;;  %2348 = vmatprep.subr.mxu0 %v466_v60  ;;  %v3549_v25 = vld [vmem:[%s3462_s4 + $0x21] sm:$0xff]  ;;  %v524_v34 = vld [vmem:[%s4393_s1 + $0x250] sm:$0xff]  ;;  %v537_v50 = vld [vmem:[%s4393_s1 + $0x2b8] sm:$0xff] }
  0x48   : > { %2404 = vmatprep.subr.mxu1 %v498_v61  ;;  %2349 = vmatpush3.msra.mxu0 %v450_v62  ;;  %v574_v27 = vld [vmem:[%s4393_s1 + $0x3e0] sm:$0xff]  ;;  %v3583_v36 = vld [vmem:[%s3462_s4 + $0x30] sm:$0xff]  ;;  %v539_v38 = vld [vmem:[%s4393_s1 + $0x2c8] sm:$0xff] }
  0x49   : > { %658 = vmatprep.mubr.f32.mxu0 %v2242_v63  ;;  %2405 = vmatpush3.msra.mxu1 %v482_v0  ;;  %v558_v29 = vld [vmem:[%s4393_s1 + $0x360] sm:$0xff]  ;;  %v3586_v37 = vld [vmem:[%s3462_s4 + $0x31] sm:$0xff]  ;;  %v523_v40 = vld [vmem:[%s4393_s1 + $0x248] sm:$0xff] }
  0x4a   : > { %763 = vmatprep.mubr.f32.mxu1 %v2250_v1  ;;  %659 = vmatmul.mubr.f32.vlgmr.msra.gmra.mxu0 %v373_v2  ;;  %v3573_v32 = vld [vmem:[%s3462_s4 + $0xc0] sm:$0xff]  ;;  %v572_v39 = vld [vmem:[%s4393_s1 + $0x3d0] sm:$0xff]  ;;  %v571_v43 = vld [vmem:[%s4393_s1 + $0x3c8] sm:$0xff] }
  0x4b   : > { %764 = vmatmul.mubr.f32.vlgmr.msra.gmra.mxu1 %v390_v3  ;;  %2430 = vmatprep.subr.mxu0 %v545_v4  ;;  %v556_v41 = vld [vmem:[%s4393_s1 + $0x350] sm:$0xff]  ;;  %v538_v42 = vld [vmem:[%s4393_s1 + $0x2c0] sm:$0xff]  ;;  %v555_v47 = vld [vmem:[%s4393_s1 + $0x348] sm:$0xff] }
  0x4c   : > { %2486 = vmatprep.subr.mxu1 %v577_v5  ;;  %2431 = vmatpush3.msra.mxu0 %v529_v6  ;;  %v3610_v44 = vld [vmem:[%s3462_s4 + $0xd0] sm:$0xff]  ;;  %v2254_v45 = vld [vmem:[%s3462_s4 + $0x160] sm:$0xff]  ;;  %v521_v52 = vld [vmem:[%s4393_s1 + $0x238] sm:$0xff] }
  0x4d   : > { %663 = vmatprep.mubr.f32.mxu0 %v3496_v7  ;;  %2432 = vmatprep.subr.mxu0 %v544_v8  ;;  %v522_v46 = vld [vmem:[%s4393_s1 + $0x240] sm:$0xff]  ;;  %v536_v54 = vld [vmem:[%s4393_s1 + $0x2b0] sm:$0xff]  ;;  %v569_v55 = vld [vmem:[%s4393_s1 + $0x3b8] sm:$0xff] }
  0x4e   : > { %768 = vmatprep.mubr.f32.mxu1 %v2251_v9  ;;  %2433 = vmatpush3.msra.mxu0 %v528_v10  ;;  %v3620_v48 = vld [vmem:[%s3462_s4 + $0x40] sm:$0xff]  ;;  %v2255_v57 = vld [vmem:[%s3462_s4 + $0x170] sm:$0xff]  ;;  %v553_v59 = vld [vmem:[%s4393_s1 + $0x338] sm:$0xff] }
  0x4f   : > { %2487 = vmatpush3.msra.mxu1 %v561_v11  ;;  %664 = vmatmul.mubr.f32.gmra.mxu0 %v3510_v12  ;;  %v3623_v49 = vld [vmem:[%s3462_s4 + $0x41] sm:$0xff]  ;;  %v520_v58 = vld [vmem:[%s4393_s1 + $0x230] sm:$0xff]  ;;  %v533_v11 = vld [vmem:[%s4393_s1 + $0x298] sm:$0xff] }
  0x50   : > { %769 = vmatmul.mubr.f32.gmra.mxu1 %v3513_v13  ;;  %2434 = vmatprep.subr.mxu0 %v543_v14  ;;  %v570_v51 = vld [vmem:[%s4393_s1 + $0x3c0] sm:$0xff]  ;;  %v3657_v60 = vld [vmem:[%s3462_s4 + $0x50] sm:$0xff]  ;;  %v535_v62 = vld [vmem:[%s4393_s1 + $0x2a8] sm:$0xff] }
  0x51   : > { %2488 = vmatprep.subr.mxu1 %v576_v15  ;;  %2435 = vmatpush3.msra.mxu0 %v527_v16  ;;  %v554_v53 = vld [vmem:[%s4393_s1 + $0x340] sm:$0xff]  ;;  %v3660_v61 = vld [vmem:[%s3462_s4 + $0x51] sm:$0xff]  ;;  %v519_v0 = vld [vmem:[%s4393_s1 + $0x228] sm:$0xff] }
  0x52   : > { %2489 = vmatpush3.msra.mxu1 %v560_v17  ;;  %2436 = vmatprep.subr.mxu0 %v542_v18  ;;  %v3647_v56 = vld [vmem:[%s3462_s4 + $0xe0] sm:$0xff]  ;;  %v568_v63 = vld [vmem:[%s4393_s1 + $0x3b0] sm:$0xff]  ;;  %v567_v3 = vld [vmem:[%s4393_s1 + $0x3a8] sm:$0xff] }
  0x53   : > { %2490 = vmatprep.subr.mxu1 %v575_v19  ;;  %668 = vmatprep.mubr.f32.mxu0 %v3536_v20  ;;  %v552_v1 = vld [vmem:[%s4393_s1 + $0x330] sm:$0xff]  ;;  %v534_v2 = vld [vmem:[%s4393_s1 + $0x2a0] sm:$0xff]  ;;  %v551_v8 = vld [vmem:[%s4393_s1 + $0x328] sm:$0xff] }
  0x54   : > { %773 = vmatprep.mubr.f32.mxu1 %v2252_v21  ;;  %2437 = vmatpush3.msra.mxu0 %v526_v22  ;;  %v3684_v4 = vld [vmem:[%s3462_s4 + $0xf0] sm:$0xff]  ;;  %v2256_v5 = vld [vmem:[%s3462_s4 + $0x180] sm:$0xff]  ;;  %v517_v15 = vld [vmem:[%s4393_s1 + $0x218] sm:$0xff] }
  0x55   : > { %2491 = vmatpush3.msra.mxu1 %v559_v23  ;;  %669 = vmatmul.mubr.f32.gmra.mxu0 %v3546_v24  ;;  %v518_v6 = vld [vmem:[%s4393_s1 + $0x220] sm:$0xff]  ;;  %v532_v17 = vld [vmem:[%s4393_s1 + $0x290] sm:$0xff]  ;;  %v565_v18 = vld [vmem:[%s4393_s1 + $0x398] sm:$0xff] }
  0x56   : > { %774 = vmatmul.mubr.f32.gmra.mxu1 %v3549_v25  ;;  %2438 = vmatprep.subr.mxu0 %v541_v26  ;;  %v3694_v9 = vld [vmem:[%s3462_s4 + $0x60] sm:$0xff]  ;;  %v2257_v21 = vld [vmem:[%s3462_s4 + $0x190] sm:$0xff]  ;;  %v549_v23 = vld [vmem:[%s4393_s1 + $0x318] sm:$0xff] }
  0x57   : > { %2492 = vmatprep.subr.mxu1 %v574_v27  ;;  %2439 = vmatpush3.msra.mxu0 %v525_v28  ;;  %v3697_v10 = vld [vmem:[%s3462_s4 + $0x61] sm:$0xff]  ;;  %v516_v22 = vld [vmem:[%s4393_s1 + $0x210] sm:$0xff] }
  0x58   : > { %2493 = vmatpush3.msra.mxu1 %v558_v29  ;;  %2440 = vmatprep.subr.mxu0 %v540_v30  ;;  %v566_v14 = vld [vmem:[%s4393_s1 + $0x3a0] sm:$0xff]  ;;  %v3731_v26 = vld [vmem:[%s3462_s4 + $0x70] sm:$0xff]  ;;  %v531_v28 = vld [vmem:[%s4393_s1 + $0x288] sm:$0xff] }
  0x59   : > { %2494 = vmatprep.subr.mxu1 %v573_v31  ;;  %673 = vmatprep.mubr.f32.mxu0 %v3573_v32  ;;  %v550_v16 = vld [vmem:[%s4393_s1 + $0x320] sm:$0xff]  ;;  %v3734_v27 = vld [vmem:[%s3462_s4 + $0x71] sm:$0xff]  ;;  %v515_v30 = vld [vmem:[%s4393_s1 + $0x208] sm:$0xff] }
  0x5a   : > { %778 = vmatprep.mubr.f32.mxu1 %v2253_v33  ;;  %2441 = vmatpush3.msra.mxu0 %v524_v34  ;;  %v3721_v19 = vld [vmem:[%s3462_s4 + $0x100] sm:$0xff]  ;;  %v564_v29 = vld [vmem:[%s4393_s1 + $0x390] sm:$0xff]  ;;  %v563_v34 = vld [vmem:[%s4393_s1 + $0x388] sm:$0xff] }
  0x5b   : > { %2495 = vmatpush3.msra.mxu1 %v557_v35  ;;  %674 = vmatmul.mubr.f32.gmra.mxu0 %v3583_v36  ;;  %v548_v31 = vld [vmem:[%s4393_s1 + $0x310] sm:$0xff]  ;;  %v530_v33 = vld [vmem:[%s4393_s1 + $0x280] sm:$0xff] }
  0x5c   : > { %779 = vmatmul.mubr.f32.gmra.mxu1 %v3586_v37  ;;  %2442 = vmatprep.subr.mxu0 %v539_v38  ;;  %v514_v35 = vld [vmem:[%s4393_s1 + $0x200] sm:$0xff] }
  0x5d   : > { %2496 = vmatprep.subr.mxu1 %v572_v39  ;;  %2443 = vmatpush3.msra.mxu0 %v523_v40  ;;  %v2266_v38 = vld [vmem:[%s3462_s4 + $0x121] sm:$0xff]  ;;  %v2258_v40 = vld [vmem:[%s3462_s4 + $0x1b0] sm:$0xff] }
  0x5e   : > { %2497 = vmatpush3.msra.mxu1 %v556_v41  ;;  %2444 = vmatprep.subr.mxu0 %v538_v42  ;;  %v547_v39 = vld [vmem:[%s4393_s1 + $0x308] sm:$0xff]  ;;  %v562_v41 = vld [vmem:[%s4393_s1 + $0x380] sm:$0xff]  ;;  %v593_v42 = vld [vmem:[%s4393_s1 + $0x478] sm:$0xff] }
  0x5f   : > { %2498 = vmatprep.subr.mxu1 %v571_v43  ;;  %678 = vmatprep.mubr.f32.mxu0 %v3610_v44  ;;  %v546_v43 = vld [vmem:[%s4393_s1 + $0x300] sm:$0xff] }
  0x60   : > { %783 = vmatprep.mubr.f32.mxu1 %v2254_v45  ;;  %2445 = vmatpush3.msra.mxu0 %v522_v46  ;;  %v592_v45 = vld [vmem:[%s4393_s1 + $0x470] sm:$0xff] }
  0x61   : > { %2499 = vmatpush3.msra.mxu1 %v555_v47  ;;  %679 = vmatmul.mubr.f32.gmra.mxu0 %v3620_v48  ;;  %v2267_v46 = vld [vmem:[%s3462_s4 + $0x131] sm:$0xff]  ;;  %v2259_v47 = vld [vmem:[%s3462_s4 + $0x1c0] sm:$0xff] }
  0x62   : > { %784 = vmatmul.mubr.f32.gmra.mxu1 %v3623_v49  ;;  %2446 = vmatprep.subr.mxu0 %v537_v50  ;;  %v591_v50 = vld [vmem:[%s4393_s1 + $0x468] sm:$0xff] }
  0x63   : > { %2500 = vmatprep.subr.mxu1 %v570_v51  ;;  %2447 = vmatpush3.msra.mxu0 %v521_v52  ;;  %v590_v51 = vld [vmem:[%s4393_s1 + $0x460] sm:$0xff] }
  0x64   : > { %2501 = vmatpush3.msra.mxu1 %v554_v53  ;;  %2448 = vmatprep.subr.mxu0 %v536_v54  ;;  %v2268_v52 = vld [vmem:[%s3462_s4 + $0x141] sm:$0xff]  ;;  %v2269_v53 = vld [vmem:[%s3462_s4 + $0x151] sm:$0xff] }
  0x65   : > { %2502 = vmatprep.subr.mxu1 %v569_v55  ;;  %683 = vmatprep.mubr.f32.mxu0 %v3647_v56  ;;  %v587_v54 = vld [vmem:[%s4393_s1 + $0x448] sm:$0xff] }
  0x66   : > { %788 = vmatprep.mubr.f32.mxu1 %v2255_v57  ;;  %2449 = vmatpush3.msra.mxu0 %v520_v58  ;;  %v2270_v55 = vld [vmem:[%s3462_s4 + $0x161] sm:$0xff]  ;;  %v585_v57 = vld [vmem:[%s4393_s1 + $0x438] sm:$0xff] }
  0x67   : > { %2503 = vmatpush3.msra.mxu1 %v553_v59  ;;  %684 = vmatmul.mubr.f32.gmra.mxu0 %v3657_v60  ;;  %v2271_v58 = vld [vmem:[%s3462_s4 + $0x171] sm:$0xff]  ;;  %v583_v59 = vld [vmem:[%s4393_s1 + $0x428] sm:$0xff] }
  0x68   : > { %789 = vmatmul.mubr.f32.gmra.mxu1 %v3660_v61  ;;  %2450 = vmatprep.subr.mxu0 %v535_v62  ;;  %v2272_v62 = vld [vmem:[%s3462_s4 + $0x181] sm:$0xff] }
  0x69   : > { %2504 = vmatprep.subr.mxu1 %v568_v63  ;;  %2451 = vmatpush3.msra.mxu0 %v519_v0  ;;  %v581_v63 = vld [vmem:[%s4393_s1 + $0x418] sm:$0xff]  ;;  %v580_v0 = vld [vmem:[%s4393_s1 + $0x410] sm:$0xff] }
  0x6a   : > { %2505 = vmatpush3.msra.mxu1 %v552_v1  ;;  %2452 = vmatprep.subr.mxu0 %v534_v2  ;;  %v2273_v1 = vld [vmem:[%s3462_s4 + $0x191] sm:$0xff] }
  0x6b   : > { %2506 = vmatprep.subr.mxu1 %v567_v3  ;;  %688 = vmatprep.mubr.f32.mxu0 %v3684_v4  ;;  %v2289_v2 = vld [vmem:[%s3462_s4 + $0x110] sm:$0xff]  ;;  %v2265_v3 = vld [vmem:[%s3462_s4 + $0x220] sm:$0xff] }
  0x6c   : > { %793 = vmatprep.mubr.f32.mxu1 %v2256_v5  ;;  %2453 = vmatpush3.msra.mxu0 %v518_v6  ;;  %v2281_v5 = vld [vmem:[%s3462_s4 + $0x80] sm:$0xff] }
  0x6d   : > { %2507 = vmatpush3.msra.mxu1 %v551_v8  ;;  %689 = vmatmul.mubr.f32.gmra.mxu0 %v3694_v9  ;;  %v578_v6 = vld [vmem:[%s4393_s1 + $0x400] sm:$0xff] }
  0x6e   : > { %794 = vmatmul.mubr.f32.gmra.mxu1 %v3697_v10  ;;  %2454 = vmatprep.subr.mxu0 %v533_v11  ;;  %v2297_v8 = vld [vmem:[%s3462_s4 + $0x81] sm:$0xff]  ;;  %v1279_v11 = vld [vmem:[#allocation3 + $0x78] sm:$0xff] }
  0x6f   : > { %2508 = vmatprep.subr.mxu1 %v566_v14  ;;  %2455 = vmatpush3.msra.mxu0 %v517_v15  ;;  %v1278_v14 = vld [vmem:[#allocation3 + $0x70] sm:$0xff]  ;;  %v1275_v15 = vld [vmem:[#allocation3 + $0x58] sm:$0xff] }
  0x70   : > { %2509 = vmatpush3.msra.mxu1 %v550_v16  ;;  %2456 = vmatprep.subr.mxu0 %v532_v17  ;;  %v1327_v16 = vld [vmem:[#allocation3 + $0x1f8] sm:$0xff]  ;;  %v1290_v17 = vld [vmem:[#allocation3 + $0xd0] sm:$0xff] }
  0x71   : > { %2510 = vmatprep.subr.mxu1 %v565_v18  ;;  %693 = vmatprep.mubr.f32.mxu0 %v3721_v19  ;;  %v1311_v18 = vld [vmem:[#allocation3 + $0x178] sm:$0xff] }
  0x72   : > { %798 = vmatprep.mubr.f32.mxu1 %v2257_v21  ;;  %2457 = vmatpush3.msra.mxu0 %v516_v22  ;;  %v1326_v21 = vld [vmem:[#allocation3 + $0x1f0] sm:$0xff]  ;;  %v1289_v22 = vld [vmem:[#allocation3 + $0xc8] sm:$0xff] }
  0x73   : > { %2511 = vmatpush3.msra.mxu1 %v549_v23  ;;  %694 = vmatmul.mubr.f32.gmra.mxu0 %v3731_v26  ;;  %v1310_v23 = vld [vmem:[#allocation3 + $0x170] sm:$0xff] }
  0x74   : > { %799 = vmatmul.mubr.f32.gmra.mxu1 %v3734_v27  ;;  %2458 = vmatprep.subr.mxu0 %v531_v28  ;;  %v1288_v28 = vld [vmem:[#allocation3 + $0xc0] sm:$0xff] }
  0x75   : > { %2512 = vmatprep.subr.mxu1 %v564_v29  ;;  %2459 = vmatpush3.msra.mxu0 %v515_v30  ;;  %v1309_v29 = vld [vmem:[#allocation3 + $0x168] sm:$0xff]  ;;  %v1272_v30 = vld [vmem:[#allocation3 + $0x40] sm:$0xff] }
  0x76   : > { %2513 = vmatpush3.msra.mxu1 %v548_v31  ;;  %2460 = vmatprep.subr.mxu0 %v530_v33  ;;  %v1324_v31 = vld [vmem:[#allocation3 + $0x1e0] sm:$0xff]  ;;  %v1287_v33 = vld [vmem:[#allocation3 + $0xb8] sm:$0xff] }
  0x77   : > { %2514 = vmatprep.subr.mxu1 %v563_v34  ;;  %2461 = vmatpush3.msra.mxu0 %v514_v35  ;;  %v1308_v34 = vld [vmem:[#allocation3 + $0x160] sm:$0xff]  ;;  %v1271_v35 = vld [vmem:[#allocation3 + $0x38] sm:$0xff] }
  0x78   : > { %868 = vmatprep.mubr.f32.mxu0 %v2266_v38  ;;  %2515 = vmatpush3.msra.mxu1 %v547_v39  ;;  %v1323_v38 = vld [vmem:[#allocation3 + $0x1d8] sm:$0xff]  ;;  %v1286_v39 = vld [vmem:[#allocation3 + $0xb0] sm:$0xff] }
  0x79   : > { %869 = vmatmul.mubr.f32.vlgmr.msra.gmra.mxu0 %v2258_v40  ;;  %2516 = vmatprep.subr.mxu1 %v562_v41  ;;  %v1307_v40 = vld [vmem:[#allocation3 + $0x158] sm:$0xff]  ;;  %v1270_v41 = vld [vmem:[#allocation3 + $0x30] sm:$0xff] }
  0x7a   : > { %2838 = vmatprep.subr.mxu0 %v593_v42  ;;  %2517 = vmatpush3.msra.mxu1 %v546_v43  ;;  %v1285_v43 = vld [vmem:[#allocation3 + $0xa8] sm:$0xff] }
  0x7b   : > { %973 = vmatprep.mubr.f32.mxu1 %v3496_v7  ;;  %2839 = vmatpush3.msra.mxu0 %v593_v42  ;;  %v2260_v7 = vld [vmem:[%s3462_s4 + $0x1d0] sm:$0xff] }
  0x7c   : > { %974 = vmatmul.mubr.f32.vlgmr.msra.gmra.mxu1 %v3510_v12  ;;  %2840 = vmatprep.subr.mxu0 %v592_v45  ;;  %v589_v12 = vld [vmem:[%s4393_s1 + $0x458] sm:$0xff]  ;;  %v1322_v42 = vld [vmem:[#allocation3 + $0x1d0] sm:$0xff] }
  0x7d   : > { %873 = vmatprep.mubr.f32.mxu0 %v2267_v46  ;;  %2841 = vmatpush3.msra.mxu0 %v592_v45  ;;  %v1306_v45 = vld [vmem:[#allocation3 + $0x150] sm:$0xff]  ;;  %v1269_v46 = vld [vmem:[#allocation3 + $0x28] sm:$0xff] }
  0x7e   : > { %978 = vmatprep.mubr.f32.mxu1 %v3536_v20  ;;  %874 = vmatmul.mubr.f32.gmra.mxu0 %v2259_v47  ;;  %v588_v20 = vld [vmem:[%s4393_s1 + $0x450] sm:$0xff]  ;;  %v1321_v47 = vld [vmem:[#allocation3 + $0x1c8] sm:$0xff] }
  0x7f   : > { %2842 = vmatprep.subr.mxu0 %v591_v50  ;;  %878 = vmatprep.mubr.f32.mxu0 %v2268_v52  ;;  %v1268_v52 = vld [vmem:[#allocation3 + $0x20] sm:$0xff] }
  0x80   : > { %2843 = vmatpush3.msra.mxu0 %v591_v50  ;;  %979 = vmatmul.mubr.f32.gmra.mxu1 %v3546_v24  ;;  %v2261_v24 = vld [vmem:[%s3462_s4 + $0x1e0] sm:$0xff] }
  0x81   : > { %2844 = vmatprep.subr.mxu0 %v590_v51  ;;  %983 = vmatprep.mubr.f32.mxu1 %v3573_v32  ;;  %v586_v32 = vld [vmem:[%s4393_s1 + $0x440] sm:$0xff] }
  0x82   : > { %2845 = vmatpush3.msra.mxu0 %v590_v51  ;;  %v1284_v50 = vld [vmem:[#allocation3 + $0xa0] sm:$0xff]  ;;  %v1305_v51 = vld [vmem:[#allocation3 + $0x148] sm:$0xff] }
  0x83   : > { %879 = vmatmul.mubr.f32.gmra.mxu0 %v2260_v7  ;;  %2846 = vmatprep.subr.mxu0 %v589_v12  ;;  %v1320_v7 = vld [vmem:[#allocation3 + $0x1c0] sm:$0xff] }
  0x84   : > { %2847 = vmatpush3.msra.mxu0 %v589_v12  ;;  %984 = vmatmul.mubr.f32.gmra.mxu1 %v3583_v36  ;;  %v2262_v36 = vld [vmem:[%s3462_s4 + $0x1f0] sm:$0xff]  ;;  %v1283_v12 = vld [vmem:[#allocation3 + $0x98] sm:$0xff] }
  0x85   : > { %2848 = vmatprep.subr.mxu0 %v588_v20  ;;  %883 = vmatprep.mubr.f32.mxu0 %v2269_v53  ;;  %v1304_v53 = vld [vmem:[#allocation3 + $0x140] sm:$0xff] }
  0x86   : > { %2849 = vmatpush3.msra.mxu0 %v588_v20  ;;  %988 = vmatprep.mubr.f32.mxu1 %v3610_v44  ;;  %v584_v44 = vld [vmem:[%s4393_s1 + $0x430] sm:$0xff]  ;;  %v3153_v20 = vmov 0.0  }
  0x87   : > { %884 = vmatmul.mubr.f32.gmra.mxu0 %v2261_v24  ;;  %2850 = vmatprep.subr.mxu0 %v587_v54  ;;  %1157 = vst [vmem:[#allocation2] sm:$0xff] %v3153_v20  ;;  %1158 = vst [vmem:[#allocation2 + $0x8] sm:$0x3] %v3153_v20  ;;  %v1267_v24 = vld [vmem:[#allocation3 + $0x18] sm:$0xff] }
  0x88   : > { %2851 = vmatpush3.msra.mxu0 %v587_v54  ;;  %989 = vmatmul.mubr.f32.gmra.mxu1 %v3620_v48  ;;  %v2263_v48 = vld [vmem:[%s3462_s4 + $0x200] sm:$0xff]  ;;  %1160 = vst [vmem:[#allocation2 + $0x90] sm:$0xff] %v3153_v20  ;;  %1161 = vst [vmem:[#allocation2 + $0x98] sm:$0x3] %v3153_v20  ;;  %v1319_v54 = vld [vmem:[#allocation3 + $0x1b8] sm:$0xff] }
  0x89   : > { %2852 = vmatprep.subr.mxu0 %v586_v32  ;;  %888 = vmatprep.mubr.f32.mxu0 %v2270_v55  ;;  %1163 = vst [vmem:[#allocation2 + $0x10] sm:$0x1] %v3153_v20  ;;  %1164 = vst [vmem:[#allocation2 + $0x20] sm:$0x1] %v3153_v20  ;;  %v1303_v55 = vld [vmem:[#allocation3 + $0x138] sm:$0xff] }
  0x8a   : > { %2853 = vmatpush3.msra.mxu0 %v586_v32  ;;  %993 = vmatprep.mubr.f32.mxu1 %v3647_v56  ;;  %v582_v56 = vld [vmem:[%s4393_s1 + $0x420] sm:$0xff]  ;;  %1165 = vst [vmem:[#allocation2 + $0x30] sm:$0x1] %v3153_v20  ;;  %1166 = vst [vmem:[#allocation2 + $0x40] sm:$0x1] %v3153_v20  ;;  %v1282_v32 = vld [vmem:[#allocation3 + $0x90] sm:$0xff] }
  0x8b   : > { %889 = vmatmul.mubr.f32.gmra.mxu0 %v2262_v36  ;;  %2854 = vmatprep.subr.mxu0 %v585_v57  ;;  %1167 = vst [vmem:[#allocation2 + $0x50] sm:$0x1] %v3153_v20  ;;  %1168 = vst [vmem:[#allocation2 + $0x60] sm:$0x1] %v3153_v20  ;;  %v1266_v36 = vld [vmem:[#allocation3 + $0x10] sm:$0xff] }
  0x8c   : > { %2855 = vmatpush3.msra.mxu0 %v585_v57  ;;  %994 = vmatmul.mubr.f32.gmra.mxu1 %v3657_v60  ;;  %v2264_v60 = vld [vmem:[%s3462_s4 + $0x210] sm:$0xff]  ;;  %1169 = vst [vmem:[#allocation2 + $0x70] sm:$0x1] %v3153_v20  ;;  %1170 = vst [vmem:[#allocation2 + $0x80] sm:$0x1] %v3153_v20 }
  0x8d   : > { %2856 = vmatprep.subr.mxu0 %v584_v44  ;;  %893 = vmatprep.mubr.f32.mxu0 %v2271_v58  ;;  %1173 = vst [vmem:[#allocation2 + $0x19] sm:$0x1] %v3153_v20  ;;  %1174 = vst [vmem:[#allocation2 + $0x29] sm:$0x1] %v3153_v20  ;;  %v1318_v57 = vld [vmem:[#allocation3 + $0x1b0] sm:$0xff] }
  0x8e   : > { %2857 = vmatpush3.msra.mxu0 %v584_v44  ;;  %998 = vmatprep.mubr.f32.mxu1 %v3684_v4  ;;  %v579_v4 = vld [vmem:[%s4393_s1 + $0x408] sm:$0xff]  ;;  %1175 = vst [vmem:[#allocation2 + $0x39] sm:$0x1] %v3153_v20  ;;  %1176 = vst [vmem:[#allocation2 + $0x49] sm:$0x1] %v3153_v20  ;;  %v1302_v58 = vld [vmem:[#allocation3 + $0x130] sm:$0xff] }
  0x8f   : > { %894 = vmatmul.mubr.f32.gmra.mxu0 %v2263_v48  ;;  %2858 = vmatprep.subr.mxu0 %v583_v59  ;;  %1177 = vst [vmem:[#allocation2 + $0x59] sm:$0x1] %v3153_v20  ;;  %1178 = vst [vmem:[#allocation2 + $0x69] sm:$0x1] %v3153_v20  ;;  %v1281_v44 = vld [vmem:[#allocation3 + $0x88] sm:$0xff] }
  0x90   : > { %2859 = vmatpush3.msra.mxu0 %v583_v59  ;;  %999 = vmatmul.mubr.f32.gmra.mxu1 %v3694_v9  ;;  %v1295_v9 = vld [vmem:[#allocation3 + $0xf8] sm:$0xff]  ;;  %1179 = vst [vmem:[#allocation2 + $0x79] sm:$0x1] %v3153_v20  ;;  %1180 = vst [vmem:[#allocation2 + $0x89] sm:$0x1] %v3153_v20  ;;  %v1265_v48 = vld [vmem:[#allocation3 + $0x8] sm:$0xff] }
  0x91   : > { %2860 = vmatprep.subr.mxu0 %v582_v56  ;;  %898 = vmatprep.mubr.f32.mxu0 %v2272_v62  ;;  %1172 = vst [vmem:[#allocation2 + $0x9] sm:$0x1] %v3153_v20  ;;  %1162 = vst [vmem:[#allocation2] sm:$0x1] %v3153_v20  ;;  %v1317_v59 = vld [vmem:[#allocation3 + $0x1a8] sm:$0xff] }
  0x92   : > { %2861 = vmatpush3.msra.mxu0 %v582_v56  ;;  %1003 = vmatprep.mubr.f32.mxu1 %v3721_v19  ;;  %v1274_v19 = vld [vmem:[#allocation3 + $0x50] sm:$0xff]  ;;  %1171 = vst [vmem:[#allocation2 + $0x90] sm:$0x1] %v3153_v20  ;;  %1181 = vst [vmem:[#allocation2 + $0x99] sm:$0x1] %v3153_v20  ;;  %v1280_v56 = vld [vmem:[#allocation3 + $0x80] sm:$0xff] }
  0x93   : > { %899 = vmatmul.mubr.f32.gmra.mxu0 %v2264_v60  ;;  %2862 = vmatprep.subr.mxu0 %v581_v63  ;;  %v1301_v62 = vld [vmem:[#allocation3 + $0x128] sm:$0xff]  ;;  %v1264_v60 = vld [vmem:[#allocation3] sm:$0xff] }
  0x94   : > { %2863 = vmatpush3.msra.mxu0 %v581_v63  ;;  %1004 = vmatmul.mubr.f32.gmra.mxu1 %v3731_v26  ;;  %v1273_v26 = vld [vmem:[#allocation3 + $0x48] sm:$0xff] }
  0x95   : > { %2864 = vmatprep.subr.mxu0 %v580_v0  ;;  %903 = vmatprep.mubr.f32.mxu0 %v2273_v1  ;;  %v1199_v63 = vld [vmem:[#allocation2 + $0x1] sm:$0xff] }
  0x96   : > { %2865 = vmatpush3.msra.mxu0 %v580_v0  ;;  %1008 = vmatprep.mubr.f32.mxu1 %v2289_v2  ;;  %v1316_v0 = vld [vmem:[#allocation3 + $0x1a0] sm:$0xff] }
  0x97   : > { %904 = vmatmul.mubr.f32.gmra.mxu0 %v2265_v3  ;;  %2866 = vmatprep.subr.mxu0 %v579_v4  ;;  %v1300_v2 = vld [vmem:[#allocation3 + $0x120] sm:$0xff]  ;;  %v1315_v3 = vld [vmem:[#allocation3 + $0x198] sm:$0xff] }
  0x98   : > { %2867 = vmatpush3.msra.mxu0 %v579_v4  ;;  %1009 = vmatmul.mubr.f32.gmra.mxu1 %v2281_v5  ;;  %v1191_v1 = vld [vmem:[#allocation2] sm:$0xff]  ;;  %v1299_v4 = vld [vmem:[#allocation3 + $0x118] sm:$0xff]  ;;  %v1314_v5 = vld [vmem:[#allocation3 + $0x190] sm:$0xff] }
  0x99   : > { %2868 = vmatprep.subr.mxu0 %v578_v6  ;;  %2870 = vmatprep.mubr.f32.mxu0 %v3513_v13  ;;  %v1294_v13 = vld [vmem:[#allocation3 + $0xf0] sm:$0xff] }
  0x9a   : > { %2869 = vmatpush3.msra.mxu0 %v578_v6  ;;  %2566 = vmatprep.subr.mxu1 %v1295_v9  ;;  %v1359_v6 = vld [vmem:[#allocation3 + $0x2f8] sm:$0xff] }
  0x9b   : > { %2871 = vmatmul.mubr.f32.vlgmr.msra.gmra.mxu0 %v3549_v25  ;;  %2567 = vmatpush3.msra.mxu1 %v1279_v11  ;;  %v1293_v25 = vld [vmem:[#allocation3 + $0xe8] sm:$0xff]  ;;  %v1343_v9 = vld [vmem:[#allocation3 + $0x278] sm:$0xff] }
  0x9c   : > { %2873 = vmatprep.mubr.f32.mxu0 %v3586_v37  ;;  %2568 = vmatprep.subr.mxu1 %v1294_v13  ;;  %v1277_v37 = vld [vmem:[#allocation3 + $0x68] sm:$0xff]  ;;  %v1358_v13 = vld [vmem:[#allocation3 + $0x2f0] sm:$0xff] }
  0x9d   : > { %2569 = vmatpush3.msra.mxu1 %v1278_v14  ;;  %2622 = vmatprep.subr.mxu0 %v1327_v16  ;;  %v1313_v11 = vld [vmem:[#allocation3 + $0x188] sm:$0xff]  ;;  %v1356_v16 = vld [vmem:[#allocation3 + $0x2e0] sm:$0xff] }
  0x9e   : > { %2570 = vmatprep.subr.mxu1 %v1293_v25  ;;  %2623 = vmatpush3.msra.mxu0 %v1311_v18  ;;  %v1297_v14 = vld [vmem:[#allocation3 + $0x108] sm:$0xff]  ;;  %v1342_v25 = vld [vmem:[#allocation3 + $0x270] sm:$0xff]  ;;  %v1355_v18 = vld [vmem:[#allocation3 + $0x2d8] sm:$0xff] }
  0x9f   : > { %2874 = vmatmul.mubr.f32.gmra.mxu0 %v3623_v49  ;;  %2571 = vmatpush3.msra.mxu1 %v1277_v37  ;;  %v1292_v49 = vld [vmem:[#allocation3 + $0xe0] sm:$0xff] }
  0xa0   : > { %2876 = vmatprep.mubr.f32.mxu0 %v3660_v61  ;;  %2572 = vmatprep.subr.mxu1 %v1292_v49  ;;  %v1276_v61 = vld [vmem:[#allocation3 + $0x60] sm:$0xff]  ;;  %v1357_v49 = vld [vmem:[#allocation3 + $0x2e8] sm:$0xff] }
  0xa1   : > { %2573 = vmatpush3.msra.mxu1 %v1276_v61  ;;  %2624 = vmatprep.subr.mxu0 %v1326_v21  ;;  %v1312_v37 = vld [vmem:[#allocation3 + $0x180] sm:$0xff]  ;;  %v1354_v21 = vld [vmem:[#allocation3 + $0x2d0] sm:$0xff] }
  0xa2   : > { %2625 = vmatpush3.msra.mxu0 %v1310_v23  ;;  %1472 = vmatprep.mubr.f32.mxu1 %v1199_v63  ;;  %v1296_v61 = vld [vmem:[#allocation3 + $0x100] sm:$0xff]  ;;  %v1353_v23 = vld [vmem:[#allocation3 + $0x2c8] sm:$0xff] }
  0xa3   : > { %2877 = vmatmul.mubr.f32.gmra.mxu0 %v3697_v10  ;;  %v1291_v10 = vld [vmem:[#allocation3 + $0xd8] sm:$0xff] }
  0xa4   : > { %2879 = vmatprep.mubr.f32.mxu0 %v3734_v27  ;;  %2574 = vmatprep.subr.mxu1 %v1291_v10  ;;  %v1325_v27 = vld [vmem:[#allocation3 + $0x1e8] sm:$0xff] }
  0xa5   : > { %2575 = vmatpush3.msra.mxu1 %v1275_v15  ;;  %2626 = vmatprep.subr.mxu0 %v1325_v27  ;;  %v1341_v10 = vld [vmem:[#allocation3 + $0x268] sm:$0xff]  ;;  %v1391_v15 = vld [vmem:[#allocation3 + $0x3f8] sm:$0xff]  ;;  %v1352_v27 = vld [vmem:[#allocation3 + $0x2c0] sm:$0xff] }
  0xa6   : > { %2576 = vmatprep.subr.mxu1 %v1290_v17  ;;  %2627 = vmatpush3.msra.mxu0 %v1309_v29  ;;  %v1340_v17 = vld [vmem:[#allocation3 + $0x260] sm:$0xff]  ;;  %v1351_v29 = vld [vmem:[#allocation3 + $0x2b8] sm:$0xff] }
  0xa7   : > { %2880 = vmatmul.mubr.f32.gmra.mxu0 %v2297_v8  ;;  %2577 = vmatpush3.msra.mxu1 %v1274_v19  ;;  %v1298_v8 = vld [vmem:[#allocation3 + $0x110] sm:$0xff]  ;;  %v1339_v19 = vld [vmem:[#allocation3 + $0x258] sm:$0xff] }
  0xa8   : > { %2578 = vmatprep.subr.mxu1 %v1289_v22  ;;  %2628 = vmatprep.subr.mxu0 %v1324_v31  ;;  %v1338_v22 = vld [vmem:[#allocation3 + $0x250] sm:$0xff] }
  0xa9   : > { %2579 = vmatpush3.msra.mxu1 %v1273_v26  ;;  %2629 = vmatpush3.msra.mxu0 %v1308_v34  ;;  %v1337_v26 = vld [vmem:[#allocation3 + $0x248] sm:$0xff]  ;;  %v1350_v31 = vld [vmem:[#allocation3 + $0x2b0] sm:$0xff] }
  0xaa   : > { %2580 = vmatprep.subr.mxu1 %v1288_v28  ;;  %2630 = vmatprep.subr.mxu0 %v1323_v38  ;;  %v1336_v28 = vld [vmem:[#allocation3 + $0x240] sm:$0xff]  ;;  %v1349_v34 = vld [vmem:[#allocation3 + $0x2a8] sm:$0xff] }
  0xab   : > { %2581 = vmatpush3.msra.mxu1 %v1272_v30  ;;  %2631 = vmatpush3.msra.mxu0 %v1307_v40  ;;  %v1335_v30 = vld [vmem:[#allocation3 + $0x238] sm:$0xff]  ;;  %v1348_v38 = vld [vmem:[#allocation3 + $0x2a0] sm:$0xff] }
  0xac   : > { %2582 = vmatprep.subr.mxu1 %v1287_v33  ;;  %2632 = vmatprep.subr.mxu0 %v1322_v42  ;;  %v1334_v33 = vld [vmem:[#allocation3 + $0x230] sm:$0xff]  ;;  %v1347_v40 = vld [vmem:[#allocation3 + $0x298] sm:$0xff] }
  0xad   : > { %2583 = vmatpush3.msra.mxu1 %v1271_v35  ;;  %2633 = vmatpush3.msra.mxu0 %v1306_v45  ;;  %v1333_v35 = vld [vmem:[#allocation3 + $0x228] sm:$0xff]  ;;  %v1346_v42 = vld [vmem:[#allocation3 + $0x290] sm:$0xff] }
  0xae   : > { %2584 = vmatprep.subr.mxu1 %v1286_v39  ;;  %2634 = vmatprep.subr.mxu0 %v1321_v47  ;;  %v1332_v39 = vld [vmem:[#allocation3 + $0x220] sm:$0xff]  ;;  %v1345_v45 = vld [vmem:[#allocation3 + $0x288] sm:$0xff] }
  0xaf   : > { %2585 = vmatpush3.msra.mxu1 %v1270_v41  ;;  %2635 = vmatpush3.msra.mxu0 %v1305_v51  ;;  %v1331_v41 = vld [vmem:[#allocation3 + $0x218] sm:$0xff]  ;;  %v1344_v47 = vld [vmem:[#allocation3 + $0x280] sm:$0xff] }
  0xb0   : > { %2586 = vmatprep.subr.mxu1 %v1285_v43  ;;  %2636 = vmatprep.subr.mxu0 %v1320_v7  ;;  %v1330_v43 = vld [vmem:[#allocation3 + $0x210] sm:$0xff]  ;;  %v3857_v51 = vld [vmem:[#allocation3 + $0x478] sm:$0xff] }
  0xb1   : > { %2587 = vmatpush3.msra.mxu1 %v1269_v46  ;;  %2637 = vmatpush3.msra.mxu0 %v1304_v53  ;;  %v1329_v46 = vld [vmem:[#allocation3 + $0x208] sm:$0xff]  ;;  %4409 = vst [vmem:[#allocation9_spill] sm:$0xff] %v3857_v51 }
  0xb2   : > { %2588 = vmatprep.subr.mxu1 %v1284_v50  ;;  %2638 = vmatprep.subr.mxu0 %v1319_v54  ;;  %v1328_v50 = vld [vmem:[#allocation3 + $0x200] sm:$0xff] }
  0xb3   : > { %2589 = vmatpush3.msra.mxu1 %v1268_v52  ;;  %2639 = vmatpush3.msra.mxu0 %v1303_v55 }
  0xb4   : > { %2590 = vmatprep.subr.mxu1 %v1283_v12  ;;  %2640 = vmatprep.subr.mxu0 %v1318_v57 }
  0xb5   : > { %2591 = vmatpush3.msra.mxu1 %v1267_v24  ;;  %2641 = vmatpush3.msra.mxu0 %v1302_v58 }
  0xb6   : > { %2592 = vmatprep.subr.mxu1 %v1282_v32  ;;  %2642 = vmatprep.subr.mxu0 %v1317_v59 }
  0xb7   : > { %2593 = vmatpush3.msra.mxu1 %v1266_v36  ;;  %2643 = vmatpush3.msra.mxu0 %v1301_v62 }
  0xb8   : > { %2594 = vmatprep.subr.mxu1 %v1281_v44  ;;  %2644 = vmatprep.subr.mxu0 %v1316_v0 }
  0xb9   : > { %2595 = vmatpush3.msra.mxu1 %v1265_v48  ;;  %2645 = vmatpush3.msra.mxu0 %v1300_v2 }
  0xba   : > { %2596 = vmatprep.subr.mxu1 %v1280_v56  ;;  %2646 = vmatprep.subr.mxu0 %v1315_v3 }
  0xbb   : > { %2597 = vmatpush3.msra.mxu1 %v1264_v60  ;;  %2647 = vmatpush3.msra.mxu0 %v1299_v4 }
  0xbc   : > { %1473 = vmatmul.mubr.f32.vlgmr.msra.gmra.mxu1 %v1191_v1  ;;  %2648 = vmatprep.subr.mxu0 %v1314_v5 }
  0xbd   : > { %2678 = vmatprep.subr.mxu1 %v1359_v6  ;;  %2649 = vmatpush3.msra.mxu0 %v1298_v8 }
  0xbe   : > { %2679 = vmatpush3.msra.mxu1 %v1343_v9  ;;  %2650 = vmatprep.subr.mxu0 %v1313_v11 }
  0xbf   : > { %2680 = vmatprep.subr.mxu1 %v1358_v13  ;;  %2651 = vmatpush3.msra.mxu0 %v1297_v14 }
  0xc0   : > { %2681 = vmatpush3.msra.mxu1 %v1342_v25  ;;  %2652 = vmatprep.subr.mxu0 %v1312_v37 }
  0xc1   : > { %2682 = vmatprep.subr.mxu1 %v1357_v49  ;;  %2653 = vmatpush3.msra.mxu0 %v1296_v61 }
  0xc2   : > { %2683 = vmatpush3.msra.mxu1 %v1341_v10  ;;  %2734 = vmatprep.subr.mxu0 %v1391_v15 }
  0xc3   : > { %2684 = vmatprep.subr.mxu1 %v1356_v16 }
  0xc4   : > { %2685 = vmatpush3.msra.mxu1 %v1340_v17 }
  0xc5   : > { %2686 = vmatprep.subr.mxu1 %v1355_v18 }
  0xc6   : > { %2687 = vmatpush3.msra.mxu1 %v1339_v19 }
  0xc7   : > { %2688 = vmatprep.subr.mxu1 %v1354_v21 }
  0xc8   : > { %2689 = vmatpush3.msra.mxu1 %v1338_v22 }
  0xc9   : > { %2690 = vmatprep.subr.mxu1 %v1353_v23 }
  0xca   : > { %2691 = vmatpush3.msra.mxu1 %v1337_v26 }
  0xcb   : > { %2692 = vmatprep.subr.mxu1 %v1352_v27 }
  0xcc   : > { %2693 = vmatpush3.msra.mxu1 %v1336_v28 }
  0xcd   : > { %2694 = vmatprep.subr.mxu1 %v1351_v29 }
  0xce   : > { %2695 = vmatpush3.msra.mxu1 %v1335_v30 }
  0xcf   : > { %2696 = vmatprep.subr.mxu1 %v1350_v31 }
  0xd0   : > { %2697 = vmatpush3.msra.mxu1 %v1334_v33 }
  0xd1   : > { %2698 = vmatprep.subr.mxu1 %v1349_v34 }
  0xd2   : > { %2699 = vmatpush3.msra.mxu1 %v1333_v35 }
  0xd3   : > { %2700 = vmatprep.subr.mxu1 %v1348_v38 }
  0xd4   : > { %2701 = vmatpush3.msra.mxu1 %v1332_v39 }
  0xd5   : > { %2702 = vmatprep.subr.mxu1 %v1347_v40 }
  0xd6   : > { %2703 = vmatpush3.msra.mxu1 %v1331_v41 }
  0xd7   : > { %2704 = vmatprep.subr.mxu1 %v1346_v42 }
  0xd8   : > { %2705 = vmatpush3.msra.mxu1 %v1330_v43 }
  0xd9   : > { %2706 = vmatprep.subr.mxu1 %v1345_v45 }
  0xda   : > { %2707 = vmatpush3.msra.mxu1 %v1329_v46 }
  0xdb   : > { %2708 = vmatprep.subr.mxu1 %v1344_v47 }
  0xdc   : > { %2709 = vmatpush3.msra.mxu1 %v1328_v50 }
  0xdd   : > { %2882 = vmatprep.subr.mxu1 %v3857_v51 }
 0x10a   : > { %v2350_v52 = vpop.f32.mrf.mxu0 }
 0x10b   : > { %v2406_v7 = vpop.f32.mrf.mxu1 }
 0x10c   : > { %v2351_v12 = vpop.f32.mrf.mxu0 }
 0x10d   : > { %v2407_v20 = vpop.f32.mrf.mxu1  ;;  %v2352_v35 = vadd.f32 %v2351_v12, %v2350_v52 }
 0x10e   : > { %v2408_v38 = vadd.f32 %v2407_v20, %v2406_v7 }
 0x10f   : > { %v2353_v53 = vpop.f32.mrf.mxu0 }
 0x110   : > { %v2409_v24 = vpop.f32.mrf.mxu1  ;;  %v766_v47 = vadd.f32 %v2408_v38, %v2352_v35 }
 0x111   : > { %v2354_v54 = vpop.f32.mrf.mxu0 }
 0x112   : > { %v2410_v32 = vpop.f32.mrf.mxu1  ;;  %v2355_v39 = vadd.f32 %v2354_v54, %v2353_v53 }
 0x113   : > { %v2411_v40 = vadd.f32 %v2410_v32, %v2409_v24 }
 0x115   : > { %v2356_v55 = vpop.f32.mrf.mxu0  ;;  %v771_v50 = vadd.f32 %v2411_v40, %v2355_v39 }
 0x116   : > { %v2412_v36 = vpop.f32.mrf.mxu1 }
 0x117   : > { %v2357_v57 = vpop.f32.mrf.mxu0 }
 0x118   : > { %v2413_v44 = vpop.f32.mrf.mxu1 }
 0x11b   : > { %v2359_v58 = vpop.f32.mrf.mxu0 }
 0x11c   : > { %v2415_v48 = vpop.f32.mrf.mxu1 }
 0x11d   : > { %v2360_v59 = vpop.f32.mrf.mxu0 }
 0x11e   : > { %v2416_v56 = vpop.f32.mrf.mxu1 }
 0x121   : > { %v2362_v62 = vpop.f32.mrf.mxu0 }
 0x122   : > { %v2418_v60 = vpop.f32.mrf.mxu1 }
 0x123   : > { %v2363_v63 = vpop.f32.mrf.mxu0 }
 0x124   : > { %v2419_v0 = vpop.f32.mrf.mxu1 }
 0x125   : > { %v2420_v52 = vadd.f32 %v2419_v0, %v2418_v60 }
 0x127   : > { %v2365_v1 = vpop.f32.mrf.mxu0 }
 0x128   : > { %v2421_v2 = vpop.f32.mrf.mxu1 }
 0x129   : > { %v2366_v3 = vpop.f32.mrf.mxu0 }
 0x12a   : > { %v2422_v4 = vpop.f32.mrf.mxu1  ;;  %v2367_v7 = vadd.f32 %v2366_v3, %v2365_v1 }
 0x12b   : > { %v2423_v20 = vadd.f32 %v2422_v4, %v2421_v2 }
 0x12d   : > { %v3860_v5 = vpop.f32.mrf.mxu0 }
 0x12e   : > { %v3862_v6 = vpop.f32.mrf.mxu1 }
 0x12f   : > { %4410 = vst [vmem:[#allocation10_spill] sm:$0xff] %v3862_v6  ;;  %v3864_v8 = vpop.f32.mrf.mxu0  ;;  %v2361_v6 = vadd.f32 %v2360_v59, %v2359_v58 }
 0x130   : > { %v3866_v9 = vpop.f32.mrf.mxu1 }
 0x131   : > { %4411 = vst [vmem:[#allocation11_spill] sm:$0xff] %v3866_v9  ;;  %v2358_v9 = vadd.f32 %v2357_v57, %v2356_v55 }
 0x133   : > { %v3868_v11 = vpop.f32.mrf.mxu0 }
 0x134   : > { %v3870_v13 = vpop.f32.mrf.mxu1 }
 0x135   : > { %4412 = vst [vmem:[#allocation12_spill] sm:$0xff] %v3870_v13  ;;  %v3872_v14 = vpop.f32.mrf.mxu0 }
 0x136   : > { %4413 = vst [vmem:[#allocation13_spill] sm:$0xff] %v3872_v14  ;;  %v3874_v37 = vpop.f32.mrf.mxu1  ;;  %v2414_v14 = vadd.f32 %v2413_v44, %v2412_v36 }
 0x137   : > { %4414 = vst [vmem:[#allocation14_spill] sm:$0xff] %v3874_v37  ;;  %v2417_v37 = vadd.f32 %v2416_v56, %v2415_v48  ;;  %v791_v56 = vadd.f32 %v2423_v20, %v2367_v7 }
 0x138   : > { %v776_v57 = vadd.f32 %v2414_v14, %v2358_v9  ;;  %v3891_v9 = vld [vmem:[%s4394_s2] ss:$0 sm:$0xff] }
 0x139   : > { %v2462_v25 = vpop.f32.mrf.mxu0 }
 0x13b   : > { %v2463_v49 = vpop.f32.mrf.mxu0 }
 0x13c   : > { %v2518_v61 = vpop.f32.mrf.mxu1  ;;  %v2464_v13 = vadd.f32 %v2463_v49, %v2462_v25  ;;  %v4418_v2 = vld [vmem:[#allocation12_spill] sm:$0xff] }
 0x13d   : > { %v4417_v0 = vld [vmem:[#allocation13_spill] sm:$0xff] }
 0x13e   : > { %v2519_v10 = vpop.f32.mrf.mxu1  ;;  %v2465_v15 = vpop.f32.mrf.mxu0  ;;  %v871_v35 = vadd.f32 %v2464_v13, %v766_v47  ;;  %v2373_v1 = vadd.f32 %v4417_v0, %v3868_v11  ;;  %v4419_v3 = vld [vmem:[#allocation14_spill] sm:$0xff] }
 0x13f   : > { %v2520_v38 = vadd.f32 %v2519_v10, %v2518_v61  ;;  %v2429_v4 = vadd.f32 %v4419_v3, %v4418_v2  ;;  %v4420_v61 = vld [vmem:[#allocation10_spill] sm:$0xff]  ;;  %v4421_v10 = vld [vmem:[#allocation11_spill] sm:$0xff] }
 0x140   : > { %v2521_v16 = vpop.f32.mrf.mxu1  ;;  %v2466_v17 = vpop.f32.mrf.mxu0 }
 0x141   : > { %v2467_v45 = vadd.f32 %v2466_v17, %v2465_v15  ;;  %v781_v17 = vadd.f32 %v2417_v37, %v2361_v6  ;;  %v976_v49 = vadd.f32 %v2520_v38, %v871_v35 }
 0x142   : > { %v2522_v18 = vpop.f32.mrf.mxu1 }
 0x143   : > { %v2468_v19 = vpop.f32.mrf.mxu0  ;;  %v876_v53 = vadd.f32 %v2467_v45, %v771_v50  ;;  %v2523_v24 = vadd.f32 %v2522_v18, %v2521_v16  ;;  %v3898_v18 = vld [vmem:[%s4395_s3] ss:$0 sm:$0xff] }
 0x144   : > { %v2524_v21 = vpop.f32.mrf.mxu1 }
 0x145   : > { %v2469_v22 = vpop.f32.mrf.mxu0  ;;  %v981_v60 = vadd.f32 %v2523_v24, %v876_v53 }
 0x146   : > { %v2525_v23 = vpop.f32.mrf.mxu1  ;;  %v2470_v55 = vadd.f32 %v2469_v22, %v2468_v19 }
 0x147   : > { %v2471_v26 = vpop.f32.mrf.mxu0  ;;  %v2526_v25 = vadd.f32 %v2525_v23, %v2524_v21  ;;  %v801_v21 = vadd.f32 %v2429_v4, %v2373_v1 }
 0x148   : > { %v2527_v27 = vpop.f32.mrf.mxu1  ;;  %v881_v14 = vadd.f32 %v2470_v55, %v776_v57 }
 0x149   : > { %v2472_v28 = vpop.f32.mrf.mxu0 }
 0x14a   : > { %v2528_v29 = vpop.f32.mrf.mxu1  ;;  %v2473_v54 = vadd.f32 %v2472_v28, %v2471_v26 }
 0x14b   : > { %v2474_v30 = vpop.f32.mrf.mxu0  ;;  %v2529_v44 = vadd.f32 %v2528_v29, %v2527_v27 }
 0x14c   : > { %v3876_v31 = vpop.f32.mrf.mxu1  ;;  %v886_v36 = vadd.f32 %v2473_v54, %v781_v17 }
 0x14d   : > { %4415 = vst [vmem:[#allocation15_spill] sm:$0xff] %v3876_v31  ;;  %v2475_v33 = vpop.f32.mrf.mxu0 }
 0x14e   : > { %v3878_v34 = vpop.f32.mrf.mxu1  ;;  %v2476_v6 = vadd.f32 %v2475_v33, %v2474_v30  ;;  %v991_v28 = vadd.f32 %v2529_v44, %v886_v36 }
 0x14f   : > { %4416 = vst [vmem:[#allocation16_spill] sm:$0xff] %v3878_v34  ;;  %v2477_v41 = vpop.f32.mrf.mxu0  ;;  %v2364_v34 = vadd.f32 %v2363_v63, %v2362_v62  ;;  %v2370_v63 = vadd.f32 %v3864_v8, %v3860_v5  ;;  %v2426_v5 = vadd.f32 %v4421_v10, %v4420_v61 }
 0x150   : > { %v2533_v42 = vpop.f32.mrf.mxu1 }
 0x151   : > { %v2478_v43 = vpop.f32.mrf.mxu0  ;;  %v786_v58 = vadd.f32 %v2420_v52, %v2364_v34  ;;  %v796_v45 = vadd.f32 %v2426_v5, %v2370_v63  ;;  %v1390_v5 = vld [vmem:[#allocation3 + $0x3f0] sm:$0xff] }
 0x152   : > { %v2534_v46 = vpop.f32.mrf.mxu1  ;;  %v2479_v48 = vadd.f32 %v2478_v43, %v2477_v41  ;;  %v986_v43 = vadd.f32 %v2526_v25, %v881_v14  ;;  %v1207_v25 = vld [vmem:[#allocation2 + $0x2] sm:$0xff] }
 0x153   : > { %v2480_v51 = vpop.f32.mrf.mxu0  ;;  %v2535_v16 = vadd.f32 %v2534_v46, %v2533_v42  ;;  %v891_v23 = vadd.f32 %v2476_v6, %v786_v58 }
 0x154   : > { %v3880_v31 = vpop.f32.mrf.mxu1  ;;  %v896_v8 = vadd.f32 %v2479_v48, %v791_v56  ;;  %v4422_v29 = vld [vmem:[#allocation15_spill] sm:$0xff] }
 0x155   : > { %v2481_v12 = vpop.f32.mrf.mxu0 }
 0x156   : > { %v2537_v32 = vpop.f32.mrf.mxu1  ;;  %v4423_v30 = vld [vmem:[#allocation16_spill] sm:$0xff]  ;;  %v2482_v34 = vadd.f32 %v2481_v12, %v2480_v51  ;;  %v1001_v52 = vadd.f32 %v2535_v16, %v896_v8  ;;  %v1374_v16 = vld [vmem:[#allocation3 + $0x370] sm:$0xff] }
 0x157   : > { %v2483_v15 = vpop.f32.mrf.mxu0  ;;  %v2532_v33 = vadd.f32 %v4423_v30, %v4422_v29  ;;  %v2538_v12 = vadd.f32 %v2537_v32, %v3880_v31  ;;  %v1386_v29 = vld [vmem:[#allocation3 + $0x3d0] sm:$0xff] }
 0x158   : > { %v2539_v62 = vpop.f32.mrf.mxu1  ;;  %v901_v51 = vadd.f32 %v2482_v34, %v796_v45  ;;  %v1385_v34 = vld [vmem:[#allocation3 + $0x3c8] sm:$0xff]  ;;  %v1383_v45 = vld [vmem:[#allocation3 + $0x3b8] sm:$0xff] }
 0x159   : > { %v2484_v59 = vpop.f32.mrf.mxu0 }
 0x15a   : > { %v2485_v11 = vadd.f32 %v2484_v59, %v2483_v15  ;;  %v2540_v22 = vpop.f32.mrf.mxu1  ;;  %v996_v15 = vadd.f32 %v2532_v33, %v891_v23  ;;  %v1006_v36 = vadd.f32 %v2538_v12, %v901_v51  ;;  %v1370_v33 = vld [vmem:[#allocation3 + $0x350] sm:$0xff]  ;;  %v1380_v12 = vld [vmem:[#allocation3 + $0x3a0] sm:$0xff] }
 0x15b   : > { %v2872_v13 = vpop.f32.mrf.mxu0  ;;  %v2541_v47 = vadd.f32 %v2540_v22, %v2539_v62 }
 0x15c   : > { %v1086_v37 = vadd.f32 %v2872_v13, %v981_v60  ;;  %v906_v46 = vadd.f32 %v2485_v11, %v801_v21  ;;  %v1389_v11 = vld [vmem:[#allocation3 + $0x3e8] sm:$0xff]  ;;  %v1371_v21 = vld [vmem:[#allocation3 + $0x358] sm:$0xff] }
 0x15d   : > { %v1080_v19 = vpop.f32.mrf.mxu0 }
 0x15e   : > { %v1127_v26 = vmul.f32 %v3891_v9, %v1086_v37  ;;  %v1081_v27 = vadd.f32 %v1080_v19, %v976_v49  ;;  %v1011_v58 = vadd.f32 %v2541_v47, %v906_v46  ;;  %v1375_v49 = vld [vmem:[#allocation3 + $0x378] sm:$0xff]  ;;  %v1373_v19 = vld [vmem:[#allocation3 + $0x368] sm:$0xff] }
 0x15f   : > { %v2875_v39 = vpop.f32.mrf.mxu0  ;;  %v1367_v46 = vld [vmem:[#allocation3 + $0x338] sm:$0xff] }
 0x160   : > { %v1142_v40 = vadd.f32 %v3898_v18, %v1127_v26  ;;  %v1126_v41 = vmul.f32 %v3891_v9, %v1081_v27  ;;  %v1096_v42 = vadd.f32 %v2875_v39, %v991_v28  ;;  %v1388_v26 = vld [vmem:[#allocation3 + $0x3e0] sm:$0xff]  ;;  %v1387_v28 = vld [vmem:[#allocation3 + $0x3d8] sm:$0xff]  ;;  %v1369_v39 = vld [vmem:[#allocation3 + $0x348] sm:$0xff] }
 0x161   : > { %v1090_v50 = vpop.f32.mrf.mxu0  ;;  %v1372_v27 = vld [vmem:[#allocation3 + $0x360] sm:$0xff] }
 0x162   : > { %v3905_v7 = vmax.f32 %v1142_v40, 0.0  ;;  %v1141_v20 = vadd.f32 %v3898_v18, %v1126_v41  ;;  %v1129_v53 = vmul.f32 %v3891_v9, %v1096_v42  ;;  %v1091_v24 = vadd.f32 %v1090_v50, %v986_v43  ;;  %v1384_v41 = vld [vmem:[#allocation3 + $0x3c0] sm:$0xff]  ;;  %v1382_v50 = vld [vmem:[#allocation3 + $0x3b0] sm:$0xff] }
 0x163   : > { %v2878_v54 = vpop.f32.mrf.mxu0  ;;  %v1368_v43 = vld [vmem:[#allocation3 + $0x340] sm:$0xff] }
 0x164   : > { %1184 = vst [vmem:[#allocation2 + $0x21] sm:$0xff] %v3905_v7  ;;  %v3911_v17 = vmax.f32 %v1141_v20, 0.0  ;;  %v1144_v35 = vadd.f32 %v3898_v18, %v1129_v53  ;;  %v1128_v38 = vmul.f32 %v3891_v9, %v1091_v24  ;;  %v1106_v55 = vadd.f32 %v2878_v54, %v1001_v52  ;;  %v1366_v20 = vld [vmem:[#allocation3 + $0x330] sm:$0xff]  ;;  %v1381_v53 = vld [vmem:[#allocation3 + $0x3a8] sm:$0xff] }
 0x165   : > { %v1100_v57 = vpop.f32.mrf.mxu0  ;;  %v1365_v24 = vld [vmem:[#allocation3 + $0x328] sm:$0xff] }
 0x166   : > { %1183 = vst [vmem:[#allocation2 + $0x11] sm:$0xff] %v3911_v17  ;;  %v3916_v48 = vmax.f32 %v1144_v35, 0.0  ;;  %v1143_v59 = vadd.f32 %v3898_v18, %v1128_v38  ;;  %v1131_v31 = vmul.f32 %v3891_v9, %v1106_v55  ;;  %v1101_v32 = vadd.f32 %v1100_v57, %v996_v15  ;;  %1477 = vmatprep.mubr.f32.mxu1 %v3911_v17  ;;  %v1364_v15 = vld [vmem:[#allocation3 + $0x320] sm:$0xff]  ;;  %v1379_v35 = vld [vmem:[#allocation3 + $0x398] sm:$0xff]  ;;  %v1378_v57 = vld [vmem:[#allocation3 + $0x390] sm:$0xff] }
 0x167   : > { %v2881_v56 = vpop.f32.mrf.mxu0  ;;  %v1363_v38 = vld [vmem:[#allocation3 + $0x318] sm:$0xff] }
 0x168   : > { %1186 = vst [vmem:[#allocation2 + $0x41] sm:$0xff] %v3916_v48  ;;  %v3922_v44 = vmax.f32 %v1143_v59, 0.0  ;;  %v1146_v62 = vadd.f32 %v3898_v18, %v1131_v31  ;;  %v1130_v60 = vmul.f32 %v3891_v9, %v1101_v32  ;;  %v1116_v63 = vadd.f32 %v2881_v56, %v1011_v58  ;;  %v1362_v59 = vld [vmem:[#allocation3 + $0x310] sm:$0xff]  ;;  %v1377_v31 = vld [vmem:[#allocation3 + $0x388] sm:$0xff] }
 0x169   : > { %v1110_v0 = vpop.f32.mrf.mxu0  ;;  %v1361_v32 = vld [vmem:[#allocation3 + $0x308] sm:$0xff] }
 0x16a   : > { %1185 = vst [vmem:[#allocation2 + $0x31] sm:$0xff] %v3922_v44  ;;  %v3927_v1 = vmax.f32 %v1146_v62, 0.0  ;;  %v1145_v2 = vadd.f32 %v3898_v18, %v1130_v60  ;;  %v1133_v3 = vmul.f32 %v3891_v9, %v1116_v63  ;;  %v1111_v4 = vadd.f32 %v1110_v0, %v1006_v36  ;;  %v4424_v36 = vld [vmem:[#allocation9_spill] sm:$0xff]  ;;  %v1406_v62 = vld [vmem:[#allocation3 + $0x470] sm:$0xff]  ;;  %v1405_v0 = vld [vmem:[#allocation3 + $0x468] sm:$0xff] }
 0x16b   : > { %v3941_v8 = vld [vmem:[#allocation2 + $0x20] sm:$0xff] }
 0x16c   : > { %1188 = vst [vmem:[#allocation2 + $0x61] sm:$0xff] %v3927_v1  ;;  %v3932_v6 = vmax.f32 %v1145_v2, 0.0  ;;  %v1148_v13 = vadd.f32 %v3898_v18, %v1133_v3  ;;  %v1132_v14 = vmul.f32 %v3891_v9, %v1111_v4  ;;  %v3957_v23 = vld [vmem:[#allocation2 + $0x22] sm:$0xff]  ;;  %v4014_v3 = vld [vmem:[%s4399_s7 + $0x70] sm:$0xff]  ;;  %v1403_v4 = vld [vmem:[#allocation3 + $0x458] sm:$0xff] }
 0x16d   : > { %v1215_v37 = vld [vmem:[#allocation2 + $0x10] sm:$0xff]  ;;  %v1376_v60 = vld [vmem:[#allocation3 + $0x380] sm:$0xff] }
 0x16e   : > { %1187 = vst [vmem:[#allocation2 + $0x51] sm:$0xff] %v3932_v6  ;;  %v3937_v61 = vmax.f32 %v1148_v13, 0.0  ;;  %v1147_v10 = vadd.f32 %v3898_v18, %v1132_v14  ;;  %1577 = vmatprep.mubr.f32.mxu0 %v1215_v37  ;;  %1478 = vmatmul.mubr.f32.gmra.mxu1 %v1215_v37  ;;  %v3949_v18 = vld [vmem:[#allocation2 + $0x12] sm:$0xff]  ;;  %v1360_v63 = vld [vmem:[#allocation3 + $0x300] sm:$0xff] }
 0x16f   : > { %1578 = vmatmul.mubr.f32.vlgmr.msra.gmra.mxu0 %v1207_v25  ;;  %1482 = vmatprep.mubr.f32.mxu1 %v3905_v7  ;;  %v3961_v30 = vld [vmem:[#allocation2 + $0x40] sm:$0xff]  ;;  %v1402_v13 = vld [vmem:[#allocation3 + $0x450] sm:$0xff]  ;;  %v1401_v25 = vld [vmem:[#allocation3 + $0x448] sm:$0xff] }
 0x170   : > { %1190 = vst [vmem:[#allocation2 + $0x81] sm:$0xff] %v3937_v61  ;;  %v3944_v9 = vmax.f32 %v1147_v10, 0.0  ;;  %1582 = vmatprep.mubr.f32.mxu0 %v3941_v8  ;;  %2735 = vmatpush3.msra.mxu0 %v1375_v49  ;;  %v3973_v47 = vld [vmem:[#allocation2 + $0x42] sm:$0xff]  ;;  %v4050_v49 = vld [vmem:[%s4399_s7 + $0x50] sm:$0xff]  ;;  %v1399_v10 = vld [vmem:[#allocation3 + $0x438] sm:$0xff] }
 0x171   : > { %2736 = vmatprep.subr.mxu0 %v1390_v5  ;;  %v3952_v22 = vld [vmem:[#allocation2 + $0x30] sm:$0xff]  ;;  %v1404_v2 = vld [vmem:[#allocation3 + $0x460] sm:$0xff] }
 0x172   : > { %1189 = vst [vmem:[#allocation2 + $0x71] sm:$0xff] %v3944_v9  ;;  %2737 = vmatpush3.msra.mxu0 %v1374_v16  ;;  %1483 = vmatmul.mubr.f32.gmra.mxu1 %v3941_v8  ;;  %v3965_v40 = vld [vmem:[#allocation2 + $0x32] sm:$0xff]  ;;  %v4032_v14 = vld [vmem:[%s4399_s7 + $0x60] sm:$0xff]  ;;  %v1397_v16 = vld [vmem:[#allocation3 + $0x428] sm:$0xff] }
 0x173   : > { %1583 = vmatmul.mubr.f32.gmra.mxu0 %v3949_v18  ;;  %2738 = vmatprep.subr.mxu0 %v1389_v11  ;;  %v3977_v52 = vld [vmem:[#allocation2 + $0x60] sm:$0xff]  ;;  %v1398_v5 = vld [vmem:[#allocation3 + $0x430] sm:$0xff] }
 0x174   : > { %1487 = vmatprep.mubr.f32.mxu1 %v3922_v44  ;;  %1587 = vmatprep.mubr.f32.mxu0 %v3952_v22  ;;  %v3989_v55 = vld [vmem:[#allocation2 + $0x62] sm:$0xff] }
 0x175   : > { %2739 = vmatpush3.msra.mxu0 %v1373_v19  ;;  %v3969_v42 = vld [vmem:[#allocation2 + $0x50] sm:$0xff]  ;;  %v1400_v37 = vld [vmem:[#allocation3 + $0x440] sm:$0xff]  ;;  %v1395_v19 = vld [vmem:[#allocation3 + $0x418] sm:$0xff] }
 0x176   : > { %2740 = vmatprep.subr.mxu0 %v1388_v26  ;;  %1488 = vmatmul.mubr.f32.gmra.mxu1 %v3952_v22  ;;  %v3981_v51 = vld [vmem:[#allocation2 + $0x52] sm:$0xff]  ;;  %v1396_v11 = vld [vmem:[#allocation3 + $0x420] sm:$0xff] }
 0x177   : > { %2741 = vmatpush3.msra.mxu0 %v1372_v27  ;;  %1492 = vmatprep.mubr.f32.mxu1 %v3916_v48  ;;  %v3993_v58 = vld [vmem:[#allocation2 + $0x80] sm:$0xff] }
 0x178   : > { %1588 = vmatmul.mubr.f32.gmra.mxu0 %v3957_v23  ;;  %2742 = vmatprep.subr.mxu0 %v1387_v28  ;;  %v1238_v26 = vld [vmem:[#allocation2 + $0x82] sm:$0xff] }
 0x179   : > { %1592 = vmatprep.mubr.f32.mxu0 %v3961_v30  ;;  %2743 = vmatpush3.msra.mxu0 %v1371_v21  ;;  %v3985_v54 = vld [vmem:[#allocation2 + $0x70] sm:$0xff]  ;;  %v4104_v27 = vld [vmem:[%s4399_s7 + $0x20] sm:$0xff]  ;;  %v1393_v28 = vld [vmem:[#allocation3 + $0x408] sm:$0xff] }
 0x17a   : > { %2744 = vmatprep.subr.mxu0 %v1386_v29  ;;  %1493 = vmatmul.mubr.f32.gmra.mxu1 %v3961_v30  ;;  %v3997_v56 = vld [vmem:[#allocation2 + $0x72] sm:$0xff]  ;;  %v1392_v21 = vld [vmem:[#allocation3 + $0x400] sm:$0xff] }
 0x17b   : > { %2745 = vmatpush3.msra.mxu0 %v1370_v33  ;;  %1497 = vmatprep.mubr.f32.mxu1 %v3932_v6  ;;  %v1973_v29 = vld [vmem:[%s4399_s7 + $0x10] sm:$0xff] }
 0x17c   : > { %1593 = vmatmul.mubr.f32.gmra.mxu0 %v3965_v40  ;;  %2746 = vmatprep.subr.mxu0 %v1385_v34  ;;  %v1247_v33 = vld [vmem:[#allocation2 + $0x90] sm:$0xff] }
 0x17d   : > { %1597 = vmatprep.mubr.f32.mxu0 %v3969_v42  ;;  %2747 = vmatpush3.msra.mxu0 %v1369_v39  ;;  %v2302_v34 = vld [vmem:[%s3462_s4 + $0x1b0] sm:$0xff]  ;;  %v2303_v39 = vld [vmem:[%s3462_s4 + $0x1c0] sm:$0xff] }
 0x17e   : > { %2748 = vmatprep.subr.mxu0 %v1384_v41  ;;  %1498 = vmatmul.mubr.f32.gmra.mxu1 %v3969_v42  ;;  %v2305_v41 = vld [vmem:[%s3462_s4 + $0x1e0] sm:$0xff] }
 0x17f   : > { %2749 = vmatpush3.msra.mxu0 %v1368_v43  ;;  %1502 = vmatprep.mubr.f32.mxu1 %v3927_v1  ;;  %v2306_v43 = vld [vmem:[%s3462_s4 + $0x1f0] sm:$0xff] }
 0x180   : > { %1598 = vmatmul.mubr.f32.gmra.mxu0 %v3973_v47  ;;  %2750 = vmatprep.subr.mxu0 %v1383_v45  ;;  %v2307_v45 = vld [vmem:[%s3462_s4 + $0x200] sm:$0xff] }
 0x181   : > { %1602 = vmatprep.mubr.f32.mxu0 %v3977_v52  ;;  %2751 = vmatpush3.msra.mxu0 %v1367_v46  ;;  %v2308_v46 = vld [vmem:[%s3462_s4 + $0x210] sm:$0xff] }
 0x182   : > { %2752 = vmatprep.subr.mxu0 %v1382_v50  ;;  %1503 = vmatmul.mubr.f32.gmra.mxu1 %v3977_v52  ;;  %v4168_v50 = vpop.f32.mrf.mxu1 }
 0x183   : > { %2753 = vmatpush3.msra.mxu0 %v1366_v20  ;;  %1507 = vmatprep.mubr.f32.mxu1 %v3944_v9 }
 0x184   : > { %1603 = vmatmul.mubr.f32.gmra.mxu0 %v3981_v51  ;;  %2754 = vmatprep.subr.mxu0 %v1381_v53 }
 0x185   : > { %1607 = vmatprep.mubr.f32.mxu0 %v3985_v54  ;;  %2755 = vmatpush3.msra.mxu0 %v1365_v24 }
 0x186   : > { %2756 = vmatprep.subr.mxu0 %v1380_v12  ;;  %1508 = vmatmul.mubr.f32.gmra.mxu1 %v3985_v54 }
 0x187   : > { %2757 = vmatpush3.msra.mxu0 %v1364_v15  ;;  %1682 = vmatprep.mubr.f32.mxu1 %v3949_v18  ;;  %v4086_v18 = vld [vmem:[%s4399_s7 + $0x30] sm:$0xff] }
 0x188   : > { %1608 = vmatmul.mubr.f32.gmra.mxu0 %v3989_v55  ;;  %2758 = vmatprep.subr.mxu0 %v1379_v35 }
 0x189   : > { %1612 = vmatprep.mubr.f32.mxu0 %v3993_v58  ;;  %2759 = vmatpush3.msra.mxu0 %v1363_v38 }
 0x18a   : > { %2760 = vmatprep.subr.mxu0 %v1378_v57  ;;  %1683 = vmatmul.mubr.f32.vlgmr.msra.gmra.mxu1 %v3911_v17  ;;  %v4006_v17 = vld [vmem:[%s4399_s7 + $0x78] sm:$0xff] }
 0x18b   : > { %2761 = vmatpush3.msra.mxu0 %v1362_v59  ;;  %2883 = vmatpush3.msra.mxu1 %v4424_v36 }
 0x18c   : > { %1613 = vmatmul.mubr.f32.gmra.mxu0 %v3997_v56  ;;  %2762 = vmatprep.subr.mxu0 %v1377_v31 }
 0x18d   : > { %1687 = vmatprep.mubr.f32.mxu1 %v3957_v23  ;;  %2763 = vmatpush3.msra.mxu0 %v1361_v32 }
 0x18e   : > { %1787 = vmatprep.mubr.f32.mxu0 %v3905_v7  ;;  %2884 = vmatprep.subr.mxu1 %v1406_v62 }
 0x18f   : > { %2764 = vmatprep.subr.mxu0 %v1376_v60  ;;  %2885 = vmatpush3.msra.mxu1 %v1406_v62 }
 0x190   : > { %2765 = vmatpush3.msra.mxu0 %v1360_v63  ;;  %2886 = vmatprep.subr.mxu1 %v1405_v0 }
 0x191   : > { %1688 = vmatmul.mubr.f32.gmra.mxu1 %v3905_v7  ;;  %1788 = vmatmul.mubr.f32.vlgmr.msra.gmra.mxu0 %v3941_v8  ;;  %v4023_v7 = vld [vmem:[%s4399_s7 + $0x68] sm:$0xff]  ;;  %v4068_v8 = vld [vmem:[%s4399_s7 + $0x40] sm:$0xff] }
 0x192   : > { %2887 = vmatpush3.msra.mxu1 %v1405_v0  ;;  %2926 = vmatprep.subr.mxu0 %v4006_v17 }
 0x193   : > { %1692 = vmatprep.mubr.f32.mxu1 %v3965_v40  ;;  %1792 = vmatprep.mubr.f32.mxu0 %v3922_v44 }
 0x194   : > { %2888 = vmatprep.subr.mxu1 %v1404_v2  ;;  %2927 = vmatpush3.msra.mxu0 %v4006_v17 }
 0x195   : > { %2889 = vmatpush3.msra.mxu1 %v1404_v2  ;;  %2928 = vmatprep.subr.mxu0 %v4014_v3 }
 0x196   : > { %2890 = vmatprep.subr.mxu1 %v1403_v4  ;;  %2929 = vmatpush3.msra.mxu0 %v4014_v3 }
 0x197   : > { %1693 = vmatmul.mubr.f32.gmra.mxu1 %v3922_v44  ;;  %1793 = vmatmul.mubr.f32.gmra.mxu0 %v3952_v22  ;;  %v4041_v44 = vld [vmem:[%s4399_s7 + $0x58] sm:$0xff]  ;;  %v1394_v22 = vld [vmem:[#allocation3 + $0x410] sm:$0xff] }
 0x198   : > { %2891 = vmatpush3.msra.mxu1 %v1403_v4  ;;  %2930 = vmatprep.subr.mxu0 %v4023_v7 }
 0x199   : > { %1697 = vmatprep.mubr.f32.mxu1 %v3973_v47  ;;  %1797 = vmatprep.mubr.f32.mxu0 %v3916_v48 }
 0x19a   : > { %2892 = vmatprep.subr.mxu1 %v1402_v13  ;;  %2931 = vmatpush3.msra.mxu0 %v4023_v7 }
 0x19b   : > { %2893 = vmatpush3.msra.mxu1 %v1402_v13  ;;  %2932 = vmatprep.subr.mxu0 %v4032_v14 }
 0x19c   : > { %2894 = vmatprep.subr.mxu1 %v1401_v25  ;;  %2933 = vmatpush3.msra.mxu0 %v4032_v14 }
 0x19d   : > { %1698 = vmatmul.mubr.f32.gmra.mxu1 %v3916_v48  ;;  %1798 = vmatmul.mubr.f32.gmra.mxu0 %v3961_v30  ;;  %v4059_v48 = vld [vmem:[%s4399_s7 + $0x48] sm:$0xff]  ;;  %v1255_v30 = vld [vmem:[#allocation2 + $0x91] sm:$0xff] }
 0x19e   : > { %2895 = vmatpush3.msra.mxu1 %v1401_v25  ;;  %2934 = vmatprep.subr.mxu0 %v4041_v44 }
 0x19f   : > { %1702 = vmatprep.mubr.f32.mxu1 %v3981_v51  ;;  %1802 = vmatprep.mubr.f32.mxu0 %v3932_v6 }
 0x1a0   : > { %2896 = vmatprep.subr.mxu1 %v1400_v37  ;;  %2935 = vmatpush3.msra.mxu0 %v4041_v44 }
 0x1a1   : > { %2897 = vmatpush3.msra.mxu1 %v1400_v37  ;;  %2936 = vmatprep.subr.mxu0 %v4050_v49 }
 0x1a2   : > { %2898 = vmatprep.subr.mxu1 %v1399_v10  ;;  %2937 = vmatpush3.msra.mxu0 %v4050_v49 }
 0x1a3   : > { %1703 = vmatmul.mubr.f32.gmra.mxu1 %v3932_v6  ;;  %1803 = vmatmul.mubr.f32.gmra.mxu0 %v3969_v42  ;;  %v4077_v6 = vld [vmem:[%s4399_s7 + $0x38] sm:$0xff] }
 0x1a4   : > { %2899 = vmatpush3.msra.mxu1 %v1399_v10  ;;  %2938 = vmatprep.subr.mxu0 %v4059_v48  ;;  %v1263_v42 = vld [vmem:[#allocation2 + $0x92] sm:$0xff] }
 0x1a5   : > { %1707 = vmatprep.mubr.f32.mxu1 %v3989_v55  ;;  %1807 = vmatprep.mubr.f32.mxu0 %v3927_v1 }
 0x1a6   : > { %2900 = vmatprep.subr.mxu1 %v1398_v5  ;;  %2939 = vmatpush3.msra.mxu0 %v4059_v48 }
 0x1a7   : > { %2901 = vmatpush3.msra.mxu1 %v1398_v5  ;;  %2940 = vmatprep.subr.mxu0 %v4068_v8 }
 0x1a8   : > { %2902 = vmatprep.subr.mxu1 %v1397_v16  ;;  %2941 = vmatpush3.msra.mxu0 %v4068_v8 }
 0x1a9   : > { %1708 = vmatmul.mubr.f32.gmra.mxu1 %v3927_v1  ;;  %1808 = vmatmul.mubr.f32.gmra.mxu0 %v3977_v52  ;;  %v4095_v1 = vld [vmem:[%s4399_s7 + $0x28] sm:$0xff]  ;;  %v4170_v52 = vpop.f32.mrf.mxu1 }
 0x1aa   : > { %2903 = vmatpush3.msra.mxu1 %v1397_v16  ;;  %2942 = vmatprep.subr.mxu0 %v4077_v6 }
 0x1ab   : > { %1712 = vmatprep.mubr.f32.mxu1 %v3997_v56  ;;  %1812 = vmatprep.mubr.f32.mxu0 %v3944_v9 }
 0x1ac   : > { %2904 = vmatprep.subr.mxu1 %v1396_v11  ;;  %2943 = vmatpush3.msra.mxu0 %v4077_v6 }
 0x1ad   : > { %2905 = vmatpush3.msra.mxu1 %v1396_v11  ;;  %2944 = vmatprep.subr.mxu0 %v4086_v18 }
 0x1ae   : > { %2906 = vmatprep.subr.mxu1 %v1395_v19  ;;  %2945 = vmatpush3.msra.mxu0 %v4086_v18 }
 0x1af   : > { %1713 = vmatmul.mubr.f32.gmra.mxu1 %v3944_v9  ;;  %1813 = vmatmul.mubr.f32.gmra.mxu0 %v3985_v54  ;;  %v4112_v9 = vld [vmem:[%s4399_s7 + $0x18] sm:$0xff] }
 0x1b0   : > { %2907 = vmatpush3.msra.mxu1 %v1395_v19  ;;  %2946 = vmatprep.subr.mxu0 %v4095_v1 }
 0x1b1   : > { %1717 = vmatprep.mubr.f32.mxu1 %v1238_v26  ;;  %1817 = vmatprep.mubr.f32.mxu0 %v3937_v61 }
 0x1b2   : > { %2908 = vmatprep.subr.mxu1 %v1394_v22  ;;  %2947 = vmatpush3.msra.mxu0 %v4095_v1 }
 0x1b3   : > { %2909 = vmatpush3.msra.mxu1 %v1394_v22  ;;  %2948 = vmatprep.subr.mxu0 %v4104_v27 }
 0x1b4   : > { %2910 = vmatprep.subr.mxu1 %v1393_v28  ;;  %2949 = vmatpush3.msra.mxu0 %v4104_v27 }
 0x1b5   : > { %1718 = vmatmul.mubr.f32.gmra.mxu1 %v3937_v61  ;;  %1818 = vmatmul.mubr.f32.gmra.mxu0 %v3993_v58  ;;  %v1972_v61 = vld [vmem:[%s4399_s7 + $0x8] sm:$0xff] }
 0x1b6   : > { %2911 = vmatpush3.msra.mxu1 %v1393_v28  ;;  %2950 = vmatprep.subr.mxu0 %v4112_v9 }
 0x1b7   : > { %2912 = vmatprep.subr.mxu1 %v1392_v21  ;;  %2914 = vmatprep.mubr.f32.mxu1 %v3957_v23  ;;  %v1971_v23 = vld [vmem:[%s4399_s7] sm:$0xff] }
 0x1b8   : > { %2951 = vmatpush3.msra.mxu0 %v4112_v9  ;;  %2913 = vmatpush3.msra.mxu1 %v1392_v21 }
 0x1b9   : > { %2952 = vmatprep.subr.mxu0 %v1973_v29  ;;  %1822 = vmatprep.mubr.f32.mxu0 %v1255_v30 }
 0x1ba   : > { %2970 = vmatprep.subr.mxu1 %v4006_v17  ;;  %2953 = vmatpush3.msra.mxu0 %v1973_v29 }
 0x1bb   : > { %1823 = vmatmul.mubr.f32.gmra.mxu0 %v1247_v33  ;;  %2915 = vmatmul.mubr.f32.vlgmr.msra.gmra.mxu1 %v3965_v40  ;;  %v2304_v40 = vld [vmem:[%s3462_s4 + $0x1d0] sm:$0xff] }
 0x1bc   : > { %2986 = vmatpush3.msra.mxu1 %v4006_v17  ;;  %2954 = vmatprep.subr.mxu0 %v1972_v61 }
 0x1bd   : > { %2917 = vmatprep.mubr.f32.mxu1 %v3973_v47  ;;  %2971 = vmatprep.subr.mxu1 %v4014_v3  ;;  %v2309_v47 = vld [vmem:[%s3462_s4 + $0x220] sm:$0xff]  ;;  %s2160_s4 = sshll.u32 %s4287_s12, 4  ;;  %s4346_s4 = int_to_ptr.vmem [resolvable:$true] %s2160_s4 }
 0x1be   : > { %2955 = vmatpush3.msra.mxu0 %v1972_v61  ;;  %2987 = vmatpush3.msra.mxu1 %v4014_v3  ;;  %s3084_s17 = scalar_lea.vmem %s4346_s4, 1024  ;;  %p3091_p11 = scmp.lt.s32.totalorder %s4346_s4, %s3089_s29 }
 0x1bf   : > { %2956 = vmatprep.subr.mxu0 %v1971_v23  ;;  %2972 = vmatprep.subr.mxu1 %v4023_v7  ;;  %p3085_p8 = scmp.ne.s32.totalorder %s4346_s4, %s3084_s17  ;;  %p3092_p12 = scmp.lt.s32.totalorder %s3090_s26, %s3084_s17 }
 0x1c0   : > { %2957 = vmatpush3.msra.mxu0 %v1971_v23  ;;  %2958 = vmatprep.mubr.f32.mxu0 %v2302_v34 }
 0x1c1   : > { %2918 = vmatmul.mubr.f32.gmra.mxu1 %v3981_v51  ;;  %2959 = vmatmul.mubr.f32.vlgmr.msra.gmra.mxu0 %v2303_v39  ;;  %p3086_p9 = pnand %p3085_p8, %p3250_p5  ;;  %p3093_p13 = por %p3092_p12, %p3091_p11 }
 0x1c2   : > { %2988 = vmatpush3.msra.mxu1 %v4023_v7  ;;  %2920 = vmatprep.mubr.f32.mxu1 %v3989_v55 }
 0x1c3   : > { %2973 = vmatprep.subr.mxu1 %v4032_v14  ;;  %2961 = vmatprep.mubr.f32.mxu0 %v2304_v40  ;;  %p3087_p10 = pneg %p3086_p9 }
 0x1c4   : > { %2989 = vmatpush3.msra.mxu1 %v4032_v14 }
 0x1c5   : > { %2974 = vmatprep.subr.mxu1 %v4041_v44  ;;  %2921 = vmatmul.mubr.f32.gmra.mxu1 %v3997_v56  ;;  %p3094_p0 = pnand %p3093_p13, %p3087_p10 }
 0x1c6   : > { %2990 = vmatpush3.msra.mxu1 %v4041_v44  ;;  %2962 = vmatmul.mubr.f32.gmra.mxu0 %v2305_v41 }
 0x1c7   : > { %2923 = vmatprep.mubr.f32.mxu1 %v1238_v26  ;;  %2975 = vmatprep.subr.mxu1 %v4050_v49 }
 0x1c8   : > { %2991 = vmatpush3.msra.mxu1 %v4050_v49 }
 0x1c9   : > { %2976 = vmatprep.subr.mxu1 %v4059_v48  ;;  %2924 = vmatmul.mubr.f32.gmra.mxu1 %v1263_v42 }
 0x1ca   : > { %2992 = vmatpush3.msra.mxu1 %v4059_v48  ;;  %2964 = vmatprep.mubr.f32.mxu1 %v2306_v43 }
 0x1cb   : > { %2977 = vmatprep.subr.mxu1 %v4068_v8 }
 0x1cc   : > { %2993 = vmatpush3.msra.mxu1 %v4068_v8 }
 0x1cd   : > { %2978 = vmatprep.subr.mxu1 %v4077_v6 }
 0x1ce   : > { %2994 = vmatpush3.msra.mxu1 %v4077_v6 }
 0x1cf   : > { %2979 = vmatprep.subr.mxu1 %v4086_v18 }
 0x1d0   : > { %2995 = vmatpush3.msra.mxu1 %v4086_v18 }
 0x1d1   : > { %2980 = vmatprep.subr.mxu1 %v4095_v1 }
 0x1d2   : > { %2996 = vmatpush3.msra.mxu1 %v4095_v1 }
 0x1d3   : > { %2981 = vmatprep.subr.mxu1 %v4104_v27 }
 0x1d4   : > { %2997 = vmatpush3.msra.mxu1 %v4104_v27 }
 0x1d5   : > { %2982 = vmatprep.subr.mxu1 %v4112_v9 }
 0x1d6   : > { %2998 = vmatpush3.msra.mxu1 %v4112_v9 }
 0x1d7   : > { %2983 = vmatprep.subr.mxu1 %v1973_v29 }
 0x1d8   : > { %2999 = vmatpush3.msra.mxu1 %v1973_v29 }
 0x1d9   : > { %2984 = vmatprep.subr.mxu1 %v1972_v61 }
 0x1da   : > { %3000 = vmatpush3.msra.mxu1 %v1972_v61 }
 0x1db   : > { %2985 = vmatprep.subr.mxu1 %v1971_v23 }
 0x1dc   : > { %3001 = vmatpush3.msra.mxu1 %v1971_v23 }
 0x1dd   : > { %2965 = vmatmul.mubr.f32.vlgmr.msra.gmra.mxu1 %v2307_v45 }
 0x1de   : > { %2967 = vmatprep.mubr.f32.mxu1 %v2308_v46 }
 0x1e1   : > { %2968 = vmatmul.mubr.f32.gmra.mxu1 %v2309_v47 }
 0x22e   : > { %v4172_v20 = vpop.f32.mrf.mxu1 }
 0x22f   : > { %v4174_v53 = vpop.f32.mrf.mxu0 }
 0x230   : > { %v2602_v24 = vpop.f32.mrf.mxu1 }
 0x231   : > { %v2655_v51 = vpop.f32.mrf.mxu0 }
 0x232   : > { %v4176_v12 = vpop.f32.mrf.mxu1 }
 0x233   : > { %v2657_v54 = vpop.f32.mrf.mxu0 }
 0x234   : > { %v4178_v15 = vpop.f32.mrf.mxu1 }
 0x235   : > { %v2658_v35 = vpop.f32.mrf.mxu0 }
 0x236   : > { %v4180_v38 = vpop.f32.mrf.mxu1 }
 0x238   : > { %v4182_v55 = vpop.f32.mrf.mxu0  ;;  %v4184_v57 = vpop.f32.mrf.mxu1 }
 0x23a   : > { %v4186_v58 = vpop.f32.mrf.mxu0  ;;  %v2610_v59 = vpop.f32.mrf.mxu1 }
 0x23c   : > { %v2663_v31 = vpop.f32.mrf.mxu0  ;;  %v2611_v32 = vpop.f32.mrf.mxu1 }
 0x23d   : > { %v2612_v56 = vadd.f32 %v2611_v32, %v2610_v59  ;;  %v2659_v59 = vadd.f32 %v2658_v35, %v2657_v54  ;;  %v2603_v32 = vadd.f32 %v2602_v24, %v4172_v20 }
 0x23e   : > { %v2664_v36 = vpop.f32.mrf.mxu0  ;;  %v4188_v62 = vpop.f32.mrf.mxu1 }
 0x240   : > { %v2666_v60 = vpop.f32.mrf.mxu0  ;;  %v4190_v63 = vpop.f32.mrf.mxu1 }
 0x242   : > { %v2667_v0 = vpop.f32.mrf.mxu0  ;;  %v2616_v17 = vpop.f32.mrf.mxu1 }
 0x243   : > { %v2668_v2 = vadd.f32 %v2667_v0, %v2666_v60 }
 0x244   : > { %v4192_v3 = vpop.f32.mrf.mxu0  ;;  %v2617_v4 = vpop.f32.mrf.mxu1 }
 0x245   : > { %v4194_v7 = vadd.f32 %v2668_v2, %v2612_v56  ;;  %v2618_v13 = vadd.f32 %v2617_v4, %v2616_v17  ;;  %v2656_v56 = vadd.f32 %v2655_v51, %v4174_v53  ;;  %v2600_v2 = vadd.f32 %v4170_v52, %v4168_v50 }
 0x246   : > { %v4196_v14 = vpop.f32.mrf.mxu0  ;;  %v4198_v25 = vpop.f32.mrf.mxu1  ;;  %v1585_v4 = vadd.f32 %v2659_v59, %v2603_v32  ;;  %v2609_v53 = vadd.f32 %v4184_v57, %v4180_v38  ;;  %v2662_v51 = vadd.f32 %v4186_v58, %v4182_v55  ;;  %v2606_v52 = vadd.f32 %v4178_v15, %v4176_v12  ;;  %v4251_v38 = vld [vmem:[%s4397_s5] ss:$0 sm:$0xff] }
 0x247   : > { %v1580_v54 = vadd.f32 %v2656_v56, %v2600_v2 }
 0x248   : > { %v2672_v44 = vpop.f32.mrf.mxu0  ;;  %v4200_v37 = vpop.f32.mrf.mxu1  ;;  %v1590_v58 = vadd.f32 %v2662_v51, %v2606_v52 }
 0x24a   : > { %v2673_v49 = vpop.f32.mrf.mxu0  ;;  %v2710_v10 = vpop.f32.mrf.mxu1 }
 0x24b   : > { %v2674_v48 = vadd.f32 %v2673_v49, %v2672_v44  ;;  %v2665_v49 = vadd.f32 %v2664_v36, %v2663_v31 }
 0x24c   : > { %v4202_v5 = vpop.f32.mrf.mxu0  ;;  %v2711_v16 = vpop.f32.mrf.mxu1 }
 0x24d   : > { %v4204_v8 = vadd.f32 %v2674_v48, %v2618_v13  ;;  %v2712_v13 = vadd.f32 %v2711_v16, %v2710_v10  ;;  %v1595_v31 = vadd.f32 %v2665_v49, %v2609_v53 }
 0x24e   : > { %v4206_v6 = vpop.f32.mrf.mxu0 }
 0x24f   : > { %4425 = vst [vmem:[#allocation13_spill] sm:$0xff] %v4204_v8  ;;  %v1685_v35 = vadd.f32 %v2712_v13, %v1580_v54 }
 0x251   : > { %v2713_v11 = vpop.f32.mrf.mxu1  ;;  %v2766_v18 = vpop.f32.mrf.mxu0 }
 0x253   : > { %v2714_v19 = vpop.f32.mrf.mxu1  ;;  %v2767_v1 = vpop.f32.mrf.mxu0 }
 0x254   : > { %v2715_v60 = vadd.f32 %v2714_v19, %v2713_v11  ;;  %v2768_v24 = vadd.f32 %v2767_v1, %v2766_v18 }
 0x256   : > { %v1690_v20 = vadd.f32 %v2715_v60, %v1585_v4  ;;  %v1790_v1 = vadd.f32 %v2768_v24, %v1685_v35 }
 0x257   : > { %v2716_v22 = vpop.f32.mrf.mxu1  ;;  %v2769_v26 = vpop.f32.mrf.mxu0 }
 0x259   : > { %v2717_v27 = vpop.f32.mrf.mxu1  ;;  %v2770_v28 = vpop.f32.mrf.mxu0 }
 0x25a   : > { %v2771_v44 = vadd.f32 %v2770_v28, %v2769_v26  ;;  %v2718_v16 = vadd.f32 %v2717_v27, %v2716_v22  ;;  %v4258_v22 = vld [vmem:[%s4400_s8] ss:$0 sm:$0xff] }
 0x25c   : > { %v1795_v50 = vadd.f32 %v2771_v44, %v1690_v20  ;;  %v1695_v27 = vadd.f32 %v2718_v16, %v1590_v58 }
 0x25d   : > { %v2719_v9 = vpop.f32.mrf.mxu1  ;;  %v2772_v21 = vpop.f32.mrf.mxu0 }
 0x25f   : > { %v2720_v29 = vpop.f32.mrf.mxu1  ;;  %v2773_v30 = vpop.f32.mrf.mxu0 }
 0x260   : > { %v2721_v11 = vadd.f32 %v2720_v29, %v2719_v9  ;;  %v2774_v12 = vadd.f32 %v2773_v30, %v2772_v21  ;;  %v4264_v29 = vld [vmem:[%s4398_s6] ss:$0 sm:$0xff] }
 0x261   : > { %v4270_v21 = vld [vmem:[%s4401_s9] ss:$0 sm:$0xff] }
 0x262   : > { %v1700_v26 = vadd.f32 %v2721_v11, %v1595_v31  ;;  %v1800_v56 = vadd.f32 %v2774_v12, %v1695_v27 }
 0x263   : > { %v4208_v33 = vpop.f32.mrf.mxu1  ;;  %v2775_v61 = vpop.f32.mrf.mxu0 }
 0x265   : > { %v4210_v23 = vpop.f32.mrf.mxu1  ;;  %v2776_v34 = vpop.f32.mrf.mxu0 }
 0x266   : > { %v2777_v19 = vadd.f32 %v2776_v34, %v2775_v61 }
 0x268   : > { %v1805_v9 = vadd.f32 %v2777_v19, %v1700_v26 }
 0x269   : > { %v4212_v39 = vpop.f32.mrf.mxu1  ;;  %v4214_v40 = vpop.f32.mrf.mxu0 }
 0x26b   : > { %v4216_v41 = vpop.f32.mrf.mxu1  ;;  %v4218_v42 = vpop.f32.mrf.mxu0 }
 0x26f   : > { %v4220_v43 = vpop.f32.mrf.mxu1  ;;  %v4222_v45 = vpop.f32.mrf.mxu0 }
 0x271   : > { %v4224_v46 = vpop.f32.mrf.mxu1  ;;  %v4226_v47 = vpop.f32.mrf.mxu0 }
 0x275   : > { %v4230_v0 = vpop.f32.mrf.mxu1  ;;  %v4232_v17 = vpop.f32.mrf.mxu0 }
 0x277   : > { %v4236_v48 = vpop.f32.mrf.mxu1  ;;  %v4238_v8 = vpop.f32.mrf.mxu0 }
 0x27b   : > { %v4246_v36 = vpop.f32.mrf.mxu0  ;;  %v2916_v10 = vpop.f32.mrf.mxu1 }
 0x27c   : > { %v1900_v18 = vadd.f32 %v2916_v10, %v1795_v50 }
 0x27d   : > { %v4253_v55 = vpop.f32.mrf.mxu0  ;;  %v1894_v57 = vpop.f32.mrf.mxu1 }
 0x27e   : > { %v1895_v15 = vadd.f32 %v1894_v57, %v1790_v1  ;;  %v1941_v28 = vmul.f32 %v4251_v38, %v1900_v18 }
 0x280   : > { %v1940_v30 = vmul.f32 %v4251_v38, %v1895_v15  ;;  %v1956_v4 = vadd.f32 %v4264_v29, %v1941_v28  ;;  %v2671_v15 = vadd.f32 %v4196_v14, %v4192_v3  ;;  %v2783_v3 = vadd.f32 %v4226_v47, %v4222_v45 }
 0x281   : > { %v2919_v61 = vpop.f32.mrf.mxu1  ;;  %v2960_v34 = vpop.f32.mrf.mxu0  ;;  %v2621_v14 = vadd.f32 %v4200_v37, %v4198_v25 }
 0x282   : > { %v1910_v59 = vadd.f32 %v2919_v61, %v1805_v9  ;;  %v2100_v32 = vmul.f32 %v2960_v34, %v4258_v22  ;;  %v1955_v20 = vadd.f32 %v4264_v29, %v1940_v30  ;;  %v2615_v9 = vadd.f32 %v4190_v63, %v4188_v62 }
 0x283   : > { %v1904_v60 = vpop.f32.mrf.mxu1  ;;  %v2053_v2 = vpop.f32.mrf.mxu0  ;;  %v2727_v61 = vadd.f32 %v4216_v41, %v4212_v39  ;;  %v2677_v34 = vadd.f32 %v4206_v6, %v4202_v5  ;;  %v2724_v30 = vadd.f32 %v4210_v23, %v4208_v33  ;;  %v2780_v62 = vadd.f32 %v4218_v42, %v4214_v40 }
 0x284   : > { %v2115_v13 = vadd.f32 %v4270_v21, %v2100_v32  ;;  %v1905_v44 = vadd.f32 %v1904_v60, %v1800_v56  ;;  %v2099_v49 = vmul.f32 %v4258_v22, %v2053_v2  ;;  %v1943_v54 = vmul.f32 %v4251_v38, %v1910_v59  ;;  %v4426_v32 = vld [vmem:[#allocation13_spill] sm:$0xff] }
 0x285   : > { %v2922_v27 = vpop.f32.mrf.mxu1  ;;  %v1605_v59 = vadd.f32 %v2671_v15, %v2615_v9  ;;  %v2733_v63 = vadd.f32 %v4236_v48, %v4230_v0  ;;  %v1615_v5 = vadd.f32 %v2677_v34, %v2621_v14  ;;  %v1705_v6 = vadd.f32 %v2724_v30, %v4194_v7 }
 0x286   : > { %v2123_v24 = vadd.f32 %v2115_v13, %v1956_v4  ;;  %v2114_v53 = vadd.f32 %v4270_v21, %v2099_v49  ;;  %v2963_v51 = vpop.f32.mrf.mxu0  ;;  %v1942_v35 = vmul.f32 %v4251_v38, %v1905_v44  ;;  %v1958_v10 = vadd.f32 %v4264_v29, %v1943_v54 }
 0x287   : > { %v2102_v11 = vmul.f32 %v2963_v51, %v4258_v22  ;;  %v1914_v39 = vpop.f32.mrf.mxu1  ;;  %v1710_v41 = vadd.f32 %v2727_v61, %v1605_v59  ;;  %v2789_v33 = vadd.f32 %v4253_v55, %v4246_v36  ;;  %v2730_v23 = vadd.f32 %v4224_v46, %v4220_v43 }
 0x288   : > { %v2131_v50 = vmax.f32 %v2123_v24, 0.0  ;;  %v2122_v52 = vadd.f32 %v2114_v53, %v1955_v20  ;;  %v2063_v31 = vpop.f32.mrf.mxu0  ;;  %v1957_v1 = vadd.f32 %v4264_v29, %v1942_v35  ;;  %v1720_v47 = vadd.f32 %v2733_v63, %v1615_v5 }
 0x289   : > { %v2117_v16 = vadd.f32 %v4270_v21, %v2102_v11  ;;  %v2101_v19 = vmul.f32 %v4258_v22, %v2063_v31  ;;  %v1815_v45 = vadd.f32 %v2783_v3, %v1710_v41  ;;  %v1810_v25 = vadd.f32 %v2780_v62, %v1705_v6  ;;  %v2925_v37 = vpop.f32.mrf.mxu1 }
 0x28a   : > { %2139 = vst [vmem:[%s4287_s12 + $0x8] sm:$0xff] %v2131_v50  ;;  %v2130_v18 = vmax.f32 %v2122_v52, 0.0  ;;  %v2786_v40 = vadd.f32 %v4238_v8, %v4232_v17  ;;  %v1825_v48 = vadd.f32 %v2789_v33, %v1720_v47  ;;  %v1715_v56 = vadd.f32 %v2730_v23, %v4426_v32 }
 0x28b   : > { %v2125_v57 = vadd.f32 %v2117_v16, %v1958_v10  ;;  %v2116_v58 = vadd.f32 %v4270_v21, %v2101_v19  ;;  %v1920_v42 = vadd.f32 %v2922_v27, %v1815_v45  ;;  %v1915_v0 = vadd.f32 %v1914_v39, %v1810_v25  ;;  %v1924_v7 = vpop.f32.mrf.mxu1 }
 0x28c   : > { %2138 = vst [vmem:[%s4287_s12] sm:$0xff] %v2130_v18  ;;  %v1930_v60 = vadd.f32 %v2925_v37, %v1825_v48  ;;  %v1820_v36 = vadd.f32 %v2786_v40, %v1715_v56 }
 0x28d   : > { %v2133_v26 = vmax.f32 %v2125_v57, 0.0  ;;  %v2124_v12 = vadd.f32 %v2116_v58, %v1957_v1  ;;  %v1945_v2 = vmul.f32 %v4251_v38, %v1920_v42  ;;  %v1944_v55 = vmul.f32 %v4251_v38, %v1915_v0 }
 0x28e   : > { %v1925_v46 = vadd.f32 %v1924_v7, %v1820_v36  ;;  %v1947_v13 = vmul.f32 %v4251_v38, %v1930_v60 }
 0x28f   : > { %2141 = vst [vmem:[%s4287_s12 + $0x18] sm:$0xff] %v2133_v26  ;;  %v2132_v28 = vmax.f32 %v2124_v12, 0.0  ;;  %v1960_v8 = vadd.f32 %v4264_v29, %v1945_v2  ;;  %v1959_v54 = vadd.f32 %v4264_v29, %v1944_v55 }
 0x290   : > { %v1946_v24 = vmul.f32 %v4251_v38, %v1925_v46  ;;  %v1962_v11 = vadd.f32 %v4264_v29, %v1947_v13 }
 0x291   : > { %2140 = vst [vmem:[%s4287_s12 + $0x10] sm:$0xff] %v2132_v28 }
 0x292   : > { %v1961_v38 = vadd.f32 %v4264_v29, %v1946_v24 }
 0x29d   : > { %v2966_v43 = vpop.f32.mrf.mxu1 }
 0x29e   : > { %v2104_v4 = vmul.f32 %v2966_v43, %v4258_v22 }
 0x29f   : > { %v2073_v44 = vpop.f32.mrf.mxu1 }
 0x2a0   : > { %v2119_v17 = vadd.f32 %v4270_v21, %v2104_v4  ;;  %v2103_v49 = vmul.f32 %v4258_v22, %v2073_v44 }
 0x2a1   : > { %v2969_v20 = vpop.f32.mrf.mxu1 }
 0x2a2   : > { %v2127_v53 = vadd.f32 %v2119_v17, %v1960_v8  ;;  %v2118_v51 = vadd.f32 %v4270_v21, %v2103_v49  ;;  %v2106_v35 = vmul.f32 %v2969_v20, %v4258_v22 }
 0x2a3   : > { %v2083_v50 = vpop.f32.mrf.mxu1 }
 0x2a4   : > { %v2135_v52 = vmax.f32 %v2127_v53, 0.0  ;;  %v2126_v31 = vadd.f32 %v2118_v51, %v1959_v54  ;;  %v2121_v10 = vadd.f32 %v4270_v21, %v2106_v35  ;;  %v2105_v16 = vmul.f32 %v4258_v22, %v2083_v50 }
 0x2a6   : > { %2143 = vst [vmem:[%s4287_s12 + $0x28] sm:$0xff] %v2135_v52  ;;  %v2134_v19 = vmax.f32 %v2126_v31, 0.0  ;;  %v2129_v18 = vadd.f32 %v2121_v10, %v1962_v11  ;;  %v2120_v1 = vadd.f32 %v4270_v21, %v2105_v16 }
 0x2a8   : > { %2142 = vst [vmem:[%s4287_s12 + $0x20] sm:$0xff] %v2134_v19  ;;  %v2137_v57 = vmax.f32 %v2129_v18, 0.0  ;;  %v2128_v58 = vadd.f32 %v2120_v1, %v1961_v38 }
 0x2aa   : > { %2145 = vst [vmem:[%s4287_s12 + $0x38] sm:$0xff] %v2137_v57  ;;  %v2136_v22 = vmax.f32 %v2128_v58, 0.0 }
 0x2ac   : > { %2144 = vst [vmem:[%s4287_s12 + $0x30] sm:$0xff] %v2136_v22 }
 0x2ad   : > { %3097 = shalt.err (!%p3094_p0)
}
 0x2ae   : > { %s3098_s25 = scalar_lea.hbm %s4344_s21, 1024  ;;  %s3102_s18 = scalar_lea.hbm %s4402_s10, 2048 }
 0x2af   : > { %p3099_p1 = scmp.ne.s32.totalorder %s4344_s21, %s3098_s25  ;;  %p3103_p4 = scmp.lt.s32.totalorder %s4344_s21, %s4402_s10 }
 0x2b0   : > { %p3104_p7 = scmp.lt.s32.totalorder %s3102_s18, %s3098_s25 }
 0x2b1   : > { %p3100_p2 = pnand %p3099_p1, %p3250_p5 }
 0x2b2   : > { %p3105_p6 = por %p3104_p7, %p3103_p4 }
 0x2b3   : > { %p3101_p3 = pneg %p3100_p2 }
 0x2b5   : > { %p3106_p8 = pnand %p3105_p6, %p3101_p3 }
 0x2b7   : > { %3109 = shalt.err (!%p3106_p8)
}
 0x2b8   : > { %s3155_s17 = smov 128   ;;  %s3156_s11 = smov 8  }
 0x2b9   : > { %3007 = dma.vmem_to_hbm [thread:$0]  (%p3250_p5), %s4346_s4, 1024, %s4344_s21, %s4352_s28, %s3155_s17, %s3155_s17, %s3156_s11  }
 0x2ba PF: > { %p3019_p9 = scmp.ge.s32.totalorder %s3148_s16, 2  ;;  %s2175_s29 = sand.u32 1, %s3136_s13  }
 0x2bb   : > { %p4427_p10 = scmp.ne.s32.totalorder %s4406_s24, 0  ;;  %s2176_s26 = scalar_lea.sflag [#allocation5], %s2175_s29 }
 0x2bd   : > { %p3014_p11 = pnand %p3019_p9, %p4427_p10 }
 0x2bf   : > { %p3015_p12 = pneg %p3014_p11 }
 0x2c1   : > { %3131 = dma.done.wait (%p3015_p12), %s2176_s26, 1024  }
 0x2c2   : > { %3133 = vsyncadd (%p3015_p12), %s2176_s26, 4294966272  ;;  %p21_p13 = scmp.ge.s32.totalorder %s3237_s19, 4   ;;  %s4428_s13 = smov %s3140_s14 }
 0x2c3   : > { %s4429_s14 = smov %s3144_s15  ;;  %s4430_s15 = smov %s3248_s22 }
 0x2c4   : > { %s4431_s16 = smov %s3237_s19  ;;  %23 = sbr.rel (!%p21_p13) target bundleno = 6 (0x6), region = 108 }
 0x2c9   :  { %2181 = vsyncpa [#allocation4], 1 }
 0x2ca   :  { %2183 = vsyncpa [#allocation4 + $0x1], 1 }
 0x2cb   :  { %2184 = vsyncpa [#allocation5], 1 }
 0x2cc   :  { %2186 = vsyncpa [#allocation5 + $0x1], 1 }

</bundles_post_ra>
